<compile_context>
chip_gen: v5e
topology: v5e:2x2
jax: 0.10.0
libtpu: 0.0.40
codegen_flags: <defaults>
</compile_context>

<pallas_src>
import functools

import jax
import jax.numpy as jnp
from jax.experimental import pallas as pl
from jax.experimental.pallas import tpu as pltpu

BN_EPS = 1e-5
LEAKY_SLOPE = 0.01
LANES = 128


def _round_up(n, m):
    return ((n + m - 1) // m) * m


def _elu(v):
    # exp(min(v,0))-1 avoids inf on the unselected branch.
    # TODO(synk): switch to jnp.expm1 if/when the Mosaic lowering supports it.
    return jnp.where(v > 0, v, jnp.exp(jnp.minimum(v, 0.0)) - 1.0)


# ---------------------------------------------------------------------------
# Fused kernel: reduce(3x3+BN+ELU) -> conv33(3x3+BN+ELU) -> increase(3x3+BN)
#               -> leaky_relu.  One grid step processes Bp images folded into M.
# ---------------------------------------------------------------------------
def bottleneck_kernel(x_ref, mask_ref, w1_ref, b1_ref, w2_ref, b2_ref,
                      w3_ref, b3_ref, o_ref, c1_ref, c2_ref, *, M_o):
    # x_ref : (M_c, L0) bf16      -- Bp stacked image canvases: per image H+2 rows,
    #                                lanes = pixel-major/channel-minor + zero pad columns
    # wK_ref: (3, L_in, W*CoutK)  -- per-dy block-banded (Toeplitz) BN-folded weights, bf16
    # bK_ref: (1, W*CoutK) f32    -- BN-folded bias tiled over the W output columns
    # mask  : (M_o, 1) f32        -- 1 on real image rows, 0 on cross-image "virtual" rows
    # o_ref : (M_c, W*cout) f32   -- lane-dense output slab
    # c1/c2 : (M_c, L1) bf16      -- inter-stage canvases (VMEM scratch)
    mask = mask_ref[...]

    def band_conv(src_ref, w_ref):
        # 3x3 conv as 3 row-shifted MXU matmuls; the dx shifts and the channel mixing are
        # folded into the banded weight, so K is channel-dense and no im2col slab exists.
        acc = jnp.dot(src_ref[pl.ds(0, M_o), :], w_ref[0],
                      preferred_element_type=jnp.float32)
        for dy in (1, 2):
            acc += jnp.dot(src_ref[pl.ds(dy, M_o), :], w_ref[dy],
                           preferred_element_type=jnp.float32)
        return acc

    # Zero the canvases once: halo rows/columns and lane padding stay 0 (SAME padding).
    c1_ref[...] = jnp.zeros_like(c1_ref)
    c2_ref[...] = jnp.zeros_like(c2_ref)

    # stage 1: reduce = conv3x3 + BN + ELU
    h = _elu(band_conv(x_ref, w1_ref) + b1_ref[...])
    hv = (h * mask).astype(jnp.bfloat16)          # zero the virtual rows, bf16 like torch-ish
    c1_ref[pl.ds(1, M_o), pl.ds(0, hv.shape[-1])] = hv

    # stage 2: conv33 = conv3x3 + BN + ELU
    h = _elu(band_conv(c1_ref, w2_ref) + b2_ref[...])
    hv = (h * mask).astype(jnp.bfloat16)
    c2_ref[pl.ds(1, M_o), pl.ds(0, hv.shape[-1])] = hv

    # stage 3: increase = conv3x3 + BN (no ELU), then the Bottleneck leaky_relu epilogue.
    y = band_conv(c2_ref, w3_ref) + b3_ref[...]
    y = jnp.where(y > 0, y, LEAKY_SLOPE * y)
    o_ref[pl.ds(0, M_o), :] = y
    n_tail = o_ref.shape[0] - M_o
    o_ref[pl.ds(M_o, n_tail), :] = jnp.zeros((n_tail, o_ref.shape[1]), jnp.float32)


# ---------------------------------------------------------------------------
# Wrapper-side weight prep: BN fold + block-banded (Toeplitz) matrices
# ---------------------------------------------------------------------------
def _fold_bn(p):
    scale = p["gamma"] / jnp.sqrt(p["var"] + BN_EPS)
    w = p["w"] * scale[None, None, None, :]          # (3, 3, cin, cout) f32, HWIO
    b = p["beta"] - p["mean"] * scale                # (cout,)
    return w, b


def _band_weights(p, W, L_in):
    """Build the 3 per-dy banded matrices T so that a whole output row (W*cout lanes)
    is  sum_dy canvas_row[i+dy] @ T[dy].

    Canvas lane layout per row: [W image columns, right-pad col, left-pad col, zero pad],
    each column holding cin dense channels.  T[dy, slot*cin+ci, j*cout+co] = w[dy,dx,ci,co]
    for the 3 valid dx taps of output column j; everything else is zero.
    """
    w, b = _fold_bn(p)
    _, _, cin, cout = w.shape
    Wc = W + 2
    q = jnp.arange(Wc)[:, None]                      # padded pixel column index
    j = jnp.arange(W)[None, :]                       # output column index
    dx = q - j                                       # (Wc, W)
    valid = (dx >= 0) & (dx <= 2)
    Ts = []
    for dy in range(3):
        taps = w[dy][jnp.clip(dx, 0, 2)]             # (Wc, W, cin, cout)
        taps = jnp.where(valid[:, :, None, None], taps, 0.0)
        taps = jnp.roll(taps, -1, axis=0)            # pixel col p -> canvas slot (p-1) mod Wc
        T = jnp.transpose(taps, (0, 2, 1, 3)).reshape(Wc * cin, W * cout)
        Ts.append(jnp.pad(T, ((0, L_in - Wc * cin), (0, 0))))
    Ts = jnp.stack(Ts).astype(jnp.bfloat16)          # (3, L_in, W*cout)
    brow = jnp.tile(b, W).reshape(1, W * cout).astype(jnp.float32)
    return Ts, brow


def bottleneck_forward(x_nchw, params):
    B, cin, H, W = x_nchw.shape
    mid = params["conv33"]["w"].shape[3]
    cout = params["increase"]["w"].shape[3]

    R = H + 2                                        # canvas rows per image (1-row halo)
    G = 2 if (B % 2 == 0 and B >= 2) else 1          # parallel grid steps (v7x has 2 TCs)
    Bp = B // G
    M_c = Bp * R                                     # canvas rows per grid step
    M_o = M_c - 2                                    # conv output rows per grid step

    L0 = _round_up((W + 2) * cin, LANES)             # stage-1 canvas lanes
    L1 = _round_up((W + 2) * mid, LANES)             # stage-2/3 canvas lanes
    N3 = W * cout                                    # lane-dense output width

    # Compact HBM input slab: image data at lanes [0, W*cin), one zero halo row top/bottom.
    x = jnp.transpose(x_nchw, (0, 2, 3, 1)).astype(jnp.bfloat16)   # NHWC
    x = x.reshape(B, H, W * cin)
    x = jnp.pad(x, ((0, 0), (1, 1), (0, L0 - W * cin)))            # (B, R, L0)
    x_rows = x.reshape(G, M_c, L0)

    # Rows of the big row-GEMM that are real image rows (others straddle image boundaries).
    mask = ((jnp.arange(M_o) % R) < H).astype(jnp.float32).reshape(M_o, 1)

    w1, b1 = _band_weights(params["reduce"], W, L0)
    w2, b2 = _band_weights(params["conv33"], W, L1)
    w3, b3 = _band_weights(params["increase"], W, L1)

    kernel = functools.partial(bottleneck_kernel, M_o=M_o)
    whole2 = lambda g: (0, 0)
    whole3 = lambda g: (0, 0, 0)
    out = pl.pallas_call(
        kernel,
        out_shape=jax.ShapeDtypeStruct((G, M_c, N3), jnp.float32),
        grid=(G,),
        in_specs=[
            pl.BlockSpec((None, M_c, L0), lambda g: (g, 0, 0)),
            pl.BlockSpec((M_o, 1), whole2),
            pl.BlockSpec((3, L0, W * mid), whole3),
            pl.BlockSpec((1, W * mid), whole2),
            pl.BlockSpec((3, L1, W * mid), whole3),
            pl.BlockSpec((1, W * mid), whole2),
            pl.BlockSpec((3, L1, N3), whole3),
            pl.BlockSpec((1, N3), whole2),
        ],
        out_specs=pl.BlockSpec((None, M_c, N3), lambda g: (g, 0, 0)),
        scratch_shapes=[pltpu.VMEM((M_c, L1), jnp.bfloat16),
                        pltpu.VMEM((M_c, L1), jnp.bfloat16)],
        compiler_params=pltpu.CompilerParams(
            dimension_semantics=("parallel",),
            vmem_limit_bytes=32 * 1024 * 1024,
        ),
    )(x_rows, mask, w1, b1, w2, b2, w3, b3)

    # Wrapper-side layout plumbing: drop the per-image halo/virtual rows, back to NCHW.
    out = out.reshape(B, R, W, cout)[:, :H]
    return jnp.transpose(out, (0, 3, 1, 2))


# ---------------------------------------------------------------------------
# Pure-JAX reference with the same bf16 quantization (independent conv path)
# ---------------------------------------------------------------------------
def bottleneck_ref(x_nchw, params):
    x = jnp.transpose(x_nchw, (0, 2, 3, 1)).astype(jnp.bfloat16)

    def stage(h, p, act):
        scale = p["gamma"] / jnp.sqrt(p["var"] + BN_EPS)
        w = (p["w"] * scale[None, None, None, :]).astype(jnp.bfloat16)
        b = p["beta"] - p["mean"] * scale
        y = jax.lax.conv_general_dilated(
            h, w, window_strides=(1, 1), padding="SAME",
            dimension_numbers=("NHWC", "HWIO", "NHWC"),
            preferred_element_type=jnp.float32)
        y = y + b[None, None, None, :]
        if act == "elu":
            y = jnp.where(y > 0, y, jnp.exp(jnp.minimum(y, 0.0)) - 1.0)
        elif act == "leaky":
            y = jnp.where(y > 0, y, LEAKY_SLOPE * y)
        return y

    h = stage(x, params["reduce"], "elu").astype(jnp.bfloat16)
    h = stage(h, params["conv33"], "elu").astype(jnp.bfloat16)
    h = stage(h, params["increase"], "leaky")
    return jnp.transpose(h, (0, 3, 1, 2))


# ---------------------------------------------------------------------------
# Deterministic parameter init (matches the module's shapes, HWIO weights)
# ---------------------------------------------------------------------------
def init_convbn(key, cin, cout):
    k1, k2, k3, k4, k5 = jax.random.split(key, 5)
    return dict(
        w=jax.random.normal(k1, (3, 3, cin, cout), jnp.float32) * 0.1,
        gamma=jax.random.uniform(k2, (cout,), jnp.float32, 0.5, 1.5),
        beta=jax.random.normal(k3, (cout,), jnp.float32) * 0.1,
        mean=jax.random.normal(k4, (cout,), jnp.float32) * 0.1,
        var=jax.random.uniform(k5, (cout,), jnp.float32, 0.5, 1.5),
    )


if __name__ == "__main__":
    key = jax.random.PRNGKey(0)
    kx, kp1, kp2, kp3 = jax.random.split(key, 4)

    B, in_channels, H, W = 4, 16, 16, 16
    out_channels = 16
    mid_channels = out_channels // 4     # Bottleneck: mid = out // 4

    x = jax.random.normal(kx, (B, in_channels, H, W), jnp.float32)   # NCHW

    params = {
        "reduce":   init_convbn(kp1, in_channels,  mid_channels),
        "conv33":   init_convbn(kp2, mid_channels, mid_channels),
        "increase": init_convbn(kp3, mid_channels, out_channels),
    }

    out = jax.block_until_ready(jax.jit(bottleneck_forward)(x, params))
    ref = jax.block_until_ready(bottleneck_ref(x, params))

    assert out.shape == (B, out_channels, H, W), out.shape
    assert bool(jnp.all(jnp.isfinite(out)))
    # bf16 MXU operands on both paths, f32 accumulation -> tight agreement.
    assert jnp.allclose(out, ref, atol=2e-2, rtol=2e-2), \
        float(jnp.max(jnp.abs(out - ref)))

    print("KERNEL_OK")
</pallas_src>

<mosaic_0001>
module attributes {stable_mosaic.version = 11 : i64} {
  func.func @bottleneck_kernel(%arg0: i32, %arg1: memref<1x36x384xbf16, #tpu.memory_space<vmem>>, %arg2: memref<34x1xf32, #tpu.memory_space<vmem>>, %arg3: memref<3x384x64xbf16, #tpu.memory_space<vmem>>, %arg4: memref<1x64xf32, #tpu.memory_space<vmem>>, %arg5: memref<3x128x64xbf16, #tpu.memory_space<vmem>>, %arg6: memref<1x64xf32, #tpu.memory_space<vmem>>, %arg7: memref<3x128x256xbf16, #tpu.memory_space<vmem>>, %arg8: memref<1x256xf32, #tpu.memory_space<vmem>>, %arg9: memref<1x36x256xf32, #tpu.memory_space<vmem>>, %arg10: memref<36x128xbf16, #tpu.memory_space<vmem>>, %arg11: memref<36x128xbf16, #tpu.memory_space<vmem>>) attributes {dimension_semantics = [#tpu.dimension_semantics<parallel>], iteration_bounds = array<i64: 2>, scalar_prefetch = 0 : i64, scratch_operands = 2 : i64, tpu.core_type = #tpu.core_type<tc>, window_params = [{transform_indices = @transform_0, window_bounds = array<i64: 1, 36, 384>}, {pipeline_mode = #tpu.pipeline_mode<synchronous>, transform_indices = @transform_1, window_bounds = array<i64: 34, 1>}, {pipeline_mode = #tpu.pipeline_mode<synchronous>, transform_indices = @transform_2, window_bounds = array<i64: 3, 384, 64>}, {pipeline_mode = #tpu.pipeline_mode<synchronous>, transform_indices = @transform_3, window_bounds = array<i64: 1, 64>}, {pipeline_mode = #tpu.pipeline_mode<synchronous>, transform_indices = @transform_4, window_bounds = array<i64: 3, 128, 64>}, {pipeline_mode = #tpu.pipeline_mode<synchronous>, transform_indices = @transform_5, window_bounds = array<i64: 1, 64>}, {pipeline_mode = #tpu.pipeline_mode<synchronous>, transform_indices = @transform_6, window_bounds = array<i64: 3, 128, 256>}, {pipeline_mode = #tpu.pipeline_mode<synchronous>, transform_indices = @transform_7, window_bounds = array<i64: 1, 256>}, {transform_indices = @transform_8, window_bounds = array<i64: 1, 36, 256>}]} {
    %c0 = arith.constant 0 : index
    %c0_0 = arith.constant 0 : index
    %0 = vector.load %arg2[%c0, %c0_0] : memref<34x1xf32, #tpu.memory_space<vmem>>, vector<34x1xf32>
    %cst = arith.constant 0.000000e+00 : bf16
    %1 = vector.broadcast %cst : bf16 to vector<36x128xbf16>
    %c0_1 = arith.constant 0 : index
    %c0_2 = arith.constant 0 : index
    %2 = vector.load %arg10[%c0_1, %c0_2] : memref<36x128xbf16, #tpu.memory_space<vmem>>, vector<36x128xbf16>
    tpu.vector_store %arg10[%c0_1, %c0_2], %1 {strides = array<i32>} : memref<36x128xbf16, #tpu.memory_space<vmem>>, vector<36x128xbf16>,
    %cst_3 = arith.constant 0.000000e+00 : bf16
    %3 = vector.broadcast %cst_3 : bf16 to vector<36x128xbf16>
    %c0_4 = arith.constant 0 : index
    %c0_5 = arith.constant 0 : index
    %4 = vector.load %arg11[%c0_4, %c0_5] : memref<36x128xbf16, #tpu.memory_space<vmem>>, vector<36x128xbf16>
    tpu.vector_store %arg11[%c0_4, %c0_5], %3 {strides = array<i32>} : memref<36x128xbf16, #tpu.memory_space<vmem>>, vector<36x128xbf16>,
    %c0_6 = arith.constant 0 : index
    %c0_7 = arith.constant 0 : index
    %c0_8 = arith.constant 0 : index
    %5 = vector.load %arg1[%c0_6, %c0_7, %c0_8] : memref<1x36x384xbf16, #tpu.memory_space<vmem>>, vector<1x34x384xbf16>
    %6 = vector.shape_cast %5 : vector<1x34x384xbf16> to vector<34x384xbf16>
    %c0_9 = arith.constant 0 : index
    %c0_10 = arith.constant 0 : index
    %c0_11 = arith.constant 0 : index
    %7 = vector.load %arg3[%c0_9, %c0_10, %c0_11] : memref<3x384x64xbf16, #tpu.memory_space<vmem>>, vector<1x384x64xbf16>
    %8 = vector.shape_cast %7 : vector<1x384x64xbf16> to vector<384x64xbf16>
    %cst_12 = arith.constant dense<0.000000e+00> : vector<34x64xf32>
    %9 = tpu.matmul %6, %8, %cst_12 {dimension_numbers = #tpu.dot_dimension_numbers<[1], [0], [0], [1], [0, 0, 1, 1], [], []>} : vector<34x384xbf16>, vector<384x64xbf16>, vector<34x64xf32> -> vector<34x64xf32>
    %c0_13 = arith.constant 0 : index
    %c1 = arith.constant 1 : index
    %c0_14 = arith.constant 0 : index
    %10 = vector.load %arg1[%c0_13, %c1, %c0_14] : memref<1x36x384xbf16, #tpu.memory_space<vmem>>, vector<1x34x384xbf16>
    %11 = vector.shape_cast %10 : vector<1x34x384xbf16> to vector<34x384xbf16>
    %c1_15 = arith.constant 1 : index
    %c0_16 = arith.constant 0 : index
    %c0_17 = arith.constant 0 : index
    %12 = vector.load %arg3[%c1_15, %c0_16, %c0_17] : memref<3x384x64xbf16, #tpu.memory_space<vmem>>, vector<1x384x64xbf16>
    %13 = vector.shape_cast %12 : vector<1x384x64xbf16> to vector<384x64xbf16>
    %cst_18 = arith.constant dense<0.000000e+00> : vector<34x64xf32>
    %14 = tpu.matmul %11, %13, %cst_18 {dimension_numbers = #tpu.dot_dimension_numbers<[1], [0], [0], [1], [0, 0, 1, 1], [], []>} : vector<34x384xbf16>, vector<384x64xbf16>, vector<34x64xf32> -> vector<34x64xf32>
    %15 = arith.addf %9, %14 : vector<34x64xf32>
    %c0_19 = arith.constant 0 : index
    %c2 = arith.constant 2 : index
    %c0_20 = arith.constant 0 : index
    %16 = vector.load %arg1[%c0_19, %c2, %c0_20] : memref<1x36x384xbf16, #tpu.memory_space<vmem>>, vector<1x34x384xbf16>
    %17 = vector.shape_cast %16 : vector<1x34x384xbf16> to vector<34x384xbf16>
    %c2_21 = arith.constant 2 : index
    %c0_22 = arith.constant 0 : index
    %c0_23 = arith.constant 0 : index
    %18 = vector.load %arg3[%c2_21, %c0_22, %c0_23] : memref<3x384x64xbf16, #tpu.memory_space<vmem>>, vector<1x384x64xbf16>
    %19 = vector.shape_cast %18 : vector<1x384x64xbf16> to vector<384x64xbf16>
    %cst_24 = arith.constant dense<0.000000e+00> : vector<34x64xf32>
    %20 = tpu.matmul %17, %19, %cst_24 {dimension_numbers = #tpu.dot_dimension_numbers<[1], [0], [0], [1], [0, 0, 1, 1], [], []>} : vector<34x384xbf16>, vector<384x64xbf16>, vector<34x64xf32> -> vector<34x64xf32>
    %21 = arith.addf %15, %20 : vector<34x64xf32>
    %c0_25 = arith.constant 0 : index
    %c0_26 = arith.constant 0 : index
    %22 = vector.load %arg4[%c0_25, %c0_26] : memref<1x64xf32, #tpu.memory_space<vmem>>, vector<1x64xf32>
    %23 = vector.broadcast %22 : vector<1x64xf32> to vector<34x64xf32>
    %24 = arith.addf %21, %23 : vector<34x64xf32>
    %cst_27 = arith.constant 0.000000e+00 : f32
    %25 = vector.broadcast %cst_27 : f32 to vector<34x64xf32>
    %26 = arith.cmpf ogt, %24, %25 : vector<34x64xf32>
    %cst_28 = arith.constant 0.000000e+00 : f32
    %27 = vector.broadcast %cst_28 : f32 to vector<34x64xf32>
    %28 = arith.minimumf %24, %27 : vector<34x64xf32>
    %29 = math.exp %28 : vector<34x64xf32>
    %cst_29 = arith.constant 1.000000e+00 : f32
    %30 = vector.broadcast %cst_29 : f32 to vector<34x64xf32>
    %31 = arith.subf %29, %30 : vector<34x64xf32>
    %32 = arith.select %26, %24, %31 : vector<34x64xi1>, vector<34x64xf32>
    %33 = vector.broadcast %0 : vector<34x1xf32> to vector<34x64xf32>
    %34 = arith.mulf %32, %33 : vector<34x64xf32>
    %35 = arith.truncf %34 : vector<34x64xf32> to vector<34x64xbf16>
    %c1_30 = arith.constant 1 : index
    %c0_31 = arith.constant 0 : index
    %36 = vector.load %arg10[%c1_30, %c0_31] : memref<36x128xbf16, #tpu.memory_space<vmem>>, vector<34x64xbf16>
    tpu.vector_store %arg10[%c1_30, %c0_31], %35 {strides = array<i32>} : memref<36x128xbf16, #tpu.memory_space<vmem>>, vector<34x64xbf16>,
    %c0_32 = arith.constant 0 : index
    %c0_33 = arith.constant 0 : index
    %37 = vector.load %arg10[%c0_32, %c0_33] : memref<36x128xbf16, #tpu.memory_space<vmem>>, vector<34x128xbf16>
    %c0_34 = arith.constant 0 : index
    %c0_35 = arith.constant 0 : index
    %c0_36 = arith.constant 0 : index
    %38 = vector.load %arg5[%c0_34, %c0_35, %c0_36] : memref<3x128x64xbf16, #tpu.memory_space<vmem>>, vector<1x128x64xbf16>
    %39 = vector.shape_cast %38 : vector<1x128x64xbf16> to vector<128x64xbf16>
    %cst_37 = arith.constant dense<0.000000e+00> : vector<34x64xf32>
    %40 = tpu.matmul %37, %39, %cst_37 {dimension_numbers = #tpu.dot_dimension_numbers<[1], [0], [0], [1], [0, 0, 1, 1], [], []>} : vector<34x128xbf16>, vector<128x64xbf16>, vector<34x64xf32> -> vector<34x64xf32>
    %c1_38 = arith.constant 1 : index
    %c0_39 = arith.constant 0 : index
    %41 = vector.load %arg10[%c1_38, %c0_39] : memref<36x128xbf16, #tpu.memory_space<vmem>>, vector<34x128xbf16>
    %c1_40 = arith.constant 1 : index
    %c0_41 = arith.constant 0 : index
    %c0_42 = arith.constant 0 : index
    %42 = vector.load %arg5[%c1_40, %c0_41, %c0_42] : memref<3x128x64xbf16, #tpu.memory_space<vmem>>, vector<1x128x64xbf16>
    %43 = vector.shape_cast %42 : vector<1x128x64xbf16> to vector<128x64xbf16>
    %cst_43 = arith.constant dense<0.000000e+00> : vector<34x64xf32>
    %44 = tpu.matmul %41, %43, %cst_43 {dimension_numbers = #tpu.dot_dimension_numbers<[1], [0], [0], [1], [0, 0, 1, 1], [], []>} : vector<34x128xbf16>, vector<128x64xbf16>, vector<34x64xf32> -> vector<34x64xf32>
    %45 = arith.addf %40, %44 : vector<34x64xf32>
    %c2_44 = arith.constant 2 : index
    %c0_45 = arith.constant 0 : index
    %46 = vector.load %arg10[%c2_44, %c0_45] : memref<36x128xbf16, #tpu.memory_space<vmem>>, vector<34x128xbf16>
    %c2_46 = arith.constant 2 : index
    %c0_47 = arith.constant 0 : index
    %c0_48 = arith.constant 0 : index
    %47 = vector.load %arg5[%c2_46, %c0_47, %c0_48] : memref<3x128x64xbf16, #tpu.memory_space<vmem>>, vector<1x128x64xbf16>
    %48 = vector.shape_cast %47 : vector<1x128x64xbf16> to vector<128x64xbf16>
    %cst_49 = arith.constant dense<0.000000e+00> : vector<34x64xf32>
    %49 = tpu.matmul %46, %48, %cst_49 {dimension_numbers = #tpu.dot_dimension_numbers<[1], [0], [0], [1], [0, 0, 1, 1], [], []>} : vector<34x128xbf16>, vector<128x64xbf16>, vector<34x64xf32> -> vector<34x64xf32>
    %50 = arith.addf %45, %49 : vector<34x64xf32>
    %c0_50 = arith.constant 0 : index
    %c0_51 = arith.constant 0 : index
    %51 = vector.load %arg6[%c0_50, %c0_51] : memref<1x64xf32, #tpu.memory_space<vmem>>, vector<1x64xf32>
    %52 = vector.broadcast %51 : vector<1x64xf32> to vector<34x64xf32>
    %53 = arith.addf %50, %52 : vector<34x64xf32>
    %cst_52 = arith.constant 0.000000e+00 : f32
    %54 = vector.broadcast %cst_52 : f32 to vector<34x64xf32>
    %55 = arith.cmpf ogt, %53, %54 : vector<34x64xf32>
    %cst_53 = arith.constant 0.000000e+00 : f32
    %56 = vector.broadcast %cst_53 : f32 to vector<34x64xf32>
    %57 = arith.minimumf %53, %56 : vector<34x64xf32>
    %58 = math.exp %57 : vector<34x64xf32>
    %cst_54 = arith.constant 1.000000e+00 : f32
    %59 = vector.broadcast %cst_54 : f32 to vector<34x64xf32>
    %60 = arith.subf %58, %59 : vector<34x64xf32>
    %61 = arith.select %55, %53, %60 : vector<34x64xi1>, vector<34x64xf32>
    %62 = vector.broadcast %0 : vector<34x1xf32> to vector<34x64xf32>
    %63 = arith.mulf %61, %62 : vector<34x64xf32>
    %64 = arith.truncf %63 : vector<34x64xf32> to vector<34x64xbf16>
    %c1_55 = arith.constant 1 : index
    %c0_56 = arith.constant 0 : index
    %65 = vector.load %arg11[%c1_55, %c0_56] : memref<36x128xbf16, #tpu.memory_space<vmem>>, vector<34x64xbf16>
    tpu.vector_store %arg11[%c1_55, %c0_56], %64 {strides = array<i32>} : memref<36x128xbf16, #tpu.memory_space<vmem>>, vector<34x64xbf16>,
    %c0_57 = arith.constant 0 : index
    %c0_58 = arith.constant 0 : index
    %66 = vector.load %arg11[%c0_57, %c0_58] : memref<36x128xbf16, #tpu.memory_space<vmem>>, vector<34x128xbf16>
    %c0_59 = arith.constant 0 : index
    %c0_60 = arith.constant 0 : index
    %c0_61 = arith.constant 0 : index
    %67 = vector.load %arg7[%c0_59, %c0_60, %c0_61] : memref<3x128x256xbf16, #tpu.memory_space<vmem>>, vector<1x128x256xbf16>
    %68 = vector.shape_cast %67 : vector<1x128x256xbf16> to vector<128x256xbf16>
    %cst_62 = arith.constant dense<0.000000e+00> : vector<34x256xf32>
    %69 = tpu.matmul %66, %68, %cst_62 {dimension_numbers = #tpu.dot_dimension_numbers<[1], [0], [0], [1], [0, 0, 1, 1], [], []>} : vector<34x128xbf16>, vector<128x256xbf16>, vector<34x256xf32> -> vector<34x256xf32>
    %c1_63 = arith.constant 1 : index
    %c0_64 = arith.constant 0 : index
    %70 = vector.load %arg11[%c1_63, %c0_64] : memref<36x128xbf16, #tpu.memory_space<vmem>>, vector<34x128xbf16>
    %c1_65 = arith.constant 1 : index
    %c0_66 = arith.constant 0 : index
    %c0_67 = arith.constant 0 : index
    %71 = vector.load %arg7[%c1_65, %c0_66, %c0_67] : memref<3x128x256xbf16, #tpu.memory_space<vmem>>, vector<1x128x256xbf16>
    %72 = vector.shape_cast %71 : vector<1x128x256xbf16> to vector<128x256xbf16>
    %cst_68 = arith.constant dense<0.000000e+00> : vector<34x256xf32>
    %73 = tpu.matmul %70, %72, %cst_68 {dimension_numbers = #tpu.dot_dimension_numbers<[1], [0], [0], [1], [0, 0, 1, 1], [], []>} : vector<34x128xbf16>, vector<128x256xbf16>, vector<34x256xf32> -> vector<34x256xf32>
    %74 = arith.addf %69, %73 : vector<34x256xf32>
    %c2_69 = arith.constant 2 : index
    %c0_70 = arith.constant 0 : index
    %75 = vector.load %arg11[%c2_69, %c0_70] : memref<36x128xbf16, #tpu.memory_space<vmem>>, vector<34x128xbf16>
    %c2_71 = arith.constant 2 : index
    %c0_72 = arith.constant 0 : index
    %c0_73 = arith.constant 0 : index
    %76 = vector.load %arg7[%c2_71, %c0_72, %c0_73] : memref<3x128x256xbf16, #tpu.memory_space<vmem>>, vector<1x128x256xbf16>
    %77 = vector.shape_cast %76 : vector<1x128x256xbf16> to vector<128x256xbf16>
    %cst_74 = arith.constant dense<0.000000e+00> : vector<34x256xf32>
    %78 = tpu.matmul %75, %77, %cst_74 {dimension_numbers = #tpu.dot_dimension_numbers<[1], [0], [0], [1], [0, 0, 1, 1], [], []>} : vector<34x128xbf16>, vector<128x256xbf16>, vector<34x256xf32> -> vector<34x256xf32>
    %79 = arith.addf %74, %78 : vector<34x256xf32>
    %c0_75 = arith.constant 0 : index
    %c0_76 = arith.constant 0 : index
    %80 = vector.load %arg8[%c0_75, %c0_76] : memref<1x256xf32, #tpu.memory_space<vmem>>, vector<1x256xf32>
    %81 = vector.broadcast %80 : vector<1x256xf32> to vector<34x256xf32>
    %82 = arith.addf %79, %81 : vector<34x256xf32>
    %cst_77 = arith.constant 0.000000e+00 : f32
    %83 = vector.broadcast %cst_77 : f32 to vector<34x256xf32>
    %84 = arith.cmpf ogt, %82, %83 : vector<34x256xf32>
    %cst_78 = arith.constant 0.00999999977 : f32
    %85 = vector.broadcast %cst_78 : f32 to vector<34x256xf32>
    %86 = arith.mulf %85, %82 : vector<34x256xf32>
    %87 = arith.select %84, %82, %86 : vector<34x256xi1>, vector<34x256xf32>
    %c0_79 = arith.constant 0 : index
    %c0_80 = arith.constant 0 : index
    %c0_81 = arith.constant 0 : index
    %88 = vector.load %arg9[%c0_79, %c0_80, %c0_81] : memref<1x36x256xf32, #tpu.memory_space<vmem>>, vector<1x34x256xf32>
    %89 = vector.shape_cast %88 : vector<1x34x256xf32> to vector<34x256xf32>
    %90 = vector.shape_cast %87 : vector<34x256xf32> to vector<1x34x256xf32>
    tpu.vector_store %arg9[%c0_79, %c0_80, %c0_81], %90 {strides = array<i32>} : memref<1x36x256xf32, #tpu.memory_space<vmem>>, vector<1x34x256xf32>,
    %cst_82 = arith.constant 0.000000e+00 : f32
    %91 = vector.broadcast %cst_82 : f32 to vector<2x256xf32>
    %c0_83 = arith.constant 0 : index
    %c34 = arith.constant 34 : index
    %c0_84 = arith.constant 0 : index
    %92 = vector.load %arg9[%c0_83, %c34, %c0_84] : memref<1x36x256xf32, #tpu.memory_space<vmem>>, vector<1x2x256xf32>
    %93 = vector.shape_cast %92 : vector<1x2x256xf32> to vector<2x256xf32>
    %94 = vector.shape_cast %91 : vector<2x256xf32> to vector<1x2x256xf32>
    tpu.vector_store %arg9[%c0_83, %c34, %c0_84], %94 {strides = array<i32>} : memref<1x36x256xf32, #tpu.memory_space<vmem>>, vector<1x2x256xf32>,
    return
  }
  func.func @transform_0(%arg0: i32) -> (i32, i32, i32) {
    %c0_i32 = arith.constant 0 : i32
    %c0_i32_0 = arith.constant 0 : i32
    %c0_i32_1 = arith.constant 0 : i32
    return %arg0, %c0_i32, %c0_i32_0 : i32, i32, i32
  }
  func.func @transform_1(%arg0: i32) -> (i32, i32) {
    %c0_i32 = arith.constant 0 : i32
    %c0_i32_0 = arith.constant 0 : i32
    %c0_i32_1 = arith.constant 0 : i32
    return %c0_i32, %c0_i32_0 : i32, i32
  }
  func.func @transform_2(%arg0: i32) -> (i32, i32, i32) {
    %c0_i32 = arith.constant 0 : i32
    %c0_i32_0 = arith.constant 0 : i32
    %c0_i32_1 = arith.constant 0 : i32
    %c0_i32_2 = arith.constant 0 : i32
    return %c0_i32, %c0_i32_0, %c0_i32_1 : i32, i32, i32
  }
  func.func @transform_3(%arg0: i32) -> (i32, i32) {
    %c0_i32 = arith.constant 0 : i32
    %c0_i32_0 = arith.constant 0 : i32
    %c0_i32_1 = arith.constant 0 : i32
    return %c0_i32, %c0_i32_0 : i32, i32
  }
  func.func @transform_4(%arg0: i32) -> (i32, i32, i32) {
    %c0_i32 = arith.constant 0 : i32
    %c0_i32_0 = arith.constant 0 : i32
    %c0_i32_1 = arith.constant 0 : i32
    %c0_i32_2 = arith.constant 0 : i32
    return %c0_i32, %c0_i32_0, %c0_i32_1 : i32, i32, i32
  }
  func.func @transform_5(%arg0: i32) -> (i32, i32) {
    %c0_i32 = arith.constant 0 : i32
    %c0_i32_0 = arith.constant 0 : i32
    %c0_i32_1 = arith.constant 0 : i32
    return %c0_i32, %c0_i32_0 : i32, i32
  }
  func.func @transform_6(%arg0: i32) -> (i32, i32, i32) {
    %c0_i32 = arith.constant 0 : i32
    %c0_i32_0 = arith.constant 0 : i32
    %c0_i32_1 = arith.constant 0 : i32
    %c0_i32_2 = arith.constant 0 : i32
    return %c0_i32, %c0_i32_0, %c0_i32_1 : i32, i32, i32
  }
  func.func @transform_7(%arg0: i32) -> (i32, i32) {
    %c0_i32 = arith.constant 0 : i32
    %c0_i32_0 = arith.constant 0 : i32
    %c0_i32_1 = arith.constant 0 : i32
    return %c0_i32, %c0_i32_0 : i32, i32
  }
  func.func @transform_8(%arg0: i32) -> (i32, i32, i32) {
    %c0_i32 = arith.constant 0 : i32
    %c0_i32_0 = arith.constant 0 : i32
    %c0_i32_1 = arith.constant 0 : i32
    return %arg0, %c0_i32, %c0_i32_0 : i32, i32, i32
  }
}

</mosaic_0001>

<bundles_post_ra>
// kernel: tile.18
= control target key start
LH: loop header
LB: loop body
LE: loop exit
PB: predicated region body
PF: predicated region fallthrough
CT: control target
= control target key end

     0   :  { %s28_s0 = inlined_call_operand.vmem [shape: f32[4], index: 0, kind: input, shape index: {}]   ;;  %s29_s1 = inlined_call_operand.vmem [shape: f32[16,4], index: 1, kind: output, shape index: {}]  }
   0x1   :  { %v4_v0 = vld [vmem:[%s28_s0] ss:$0 sm:$0xff] }
   0x2   :  { %5 = vst [vmem:[%s29_s1] sm:$0xff] %v4_v0 }
   0x3   :  { %8 = vst [vmem:[%s29_s1 + $0x8] sm:$0xff] %v4_v0 }

// kernel: tile.19
= control target key start
LH: loop header
LB: loop body
LE: loop exit
PB: predicated region body
PF: predicated region fallthrough
CT: control target
= control target key end

     0   :  { %s131_s10 = smov 60   ;;  %s132_s11 = smov 52   ;;  %vm3_vm0 = vcmask 31744   ;;  %vm9_vm1 = vcmask 523744   ;;  %vm15_vm2 = vcmask 490944   ;;  %vm21_vm3 = vcmask 458144   ;;  %s207_s0 = inlined_call_operand.vmem [shape: f32[16,4], index: 0, kind: input, shape index: {}]   ;;  %s208_s1 = inlined_call_operand.vmem [shape: f32[1,64], index: 1, kind: output, shape index: {}]  }
   0x1   :  { %v101_v0 = vld [vmem:[%s207_s0 + $0xf] sm:$0x1]   ;;  %v103_v1 = vld [vmem:[%s207_s0 + $0xd] sm:$0x1]   ;;  %v105_v2 = vld [vmem:[%s207_s0 + $0xb] sm:$0x1]  }
   0x2   :  { %7 = vrot.lane.b32.xlu0 %v101_v0, %s131_s10  ;;  %19 = vrot.lane.b32.xlu1 %v103_v1, %s132_s11  ;;  %s133_s14 = smov 44   ;;  %v102_v3 = vld [vmem:[%s207_s0 + $0xe] sm:$0x1]   ;;  %v104_v4 = vld [vmem:[%s207_s0 + $0xc] sm:$0x1]   ;;  %s134_s19 = smov 56  }
   0x3   :  { %31 = vrot.lane.b32.xlu2 %v105_v2, %s133_s14  ;;  %s135_s20 = smov 48   ;;  %v106_v5 = vld [vmem:[%s207_s0 + $0xa] sm:$0x1]   ;;  %s136_s23 = smov 40   ;;  %v107_v6 = vld [vmem:[%s207_s0 + $0x9] sm:$0x1]  }
   0x4   :  { %v108_v7 = vld [vmem:[%s207_s0 + $0x8] sm:$0x1]   ;;  %s137_s28 = smov 36   ;;  %s138_s29 = smov 32   ;;  %v109_v8 = vld [vmem:[%s207_s0 + $0x7] sm:$0x1]  }
   0x5   :  { %s139_s3 = smov 28   ;;  %v110_v9 = vld [vmem:[%s207_s0 + $0x6] sm:$0x1]   ;;  %v111_v10 = vld [vmem:[%s207_s0 + $0x5] sm:$0x1]   ;;  %s140_s8 = smov 24  }
   0x6   :  { %s141_s9 = smov 20   ;;  %v112_v11 = vld [vmem:[%s207_s0 + $0x4] sm:$0x1]   ;;  %s142_s12 = smov 16   ;;  %v113_v12 = vld [vmem:[%s207_s0 + $0x3] sm:$0x1]  }
   0x7   :  { %v114_v13 = vld [vmem:[%s207_s0 + $0x2] sm:$0x1]   ;;  %s143_s17 = smov 12   ;;  %s144_s18 = smov 8   ;;  %v115_v14 = vld [vmem:[%s207_s0 + $0x1] sm:$0x1]  }
   0x8   :  { %s145_s21 = smov 4   ;;  %v2_v15 = vld [vmem:[%s207_s0] sm:$0x1]   ;;  %vm27_vm4 = vcmask 425344   ;;  %vm33_vm5 = vcmask 392544   ;;  %vm39_vm6 = vcmask 359744  }
   0x9   :  { %4 = vst.msk [vmem:[#allocation0] sm:$0x1] %vm3_vm0, %v2_v15   ;;  %vm45_vm7 = vcmask 326944   ;;  %vm51_vm8 = vcmask 294144   ;;  %vm57_vm9 = vcmask 261344   ;;  %vm63_vm10 = vcmask 228544  }
   0xa   :  { %13 = vrot.lane.b32.xlu0 %v102_v3, %s134_s19  ;;  %25 = vrot.lane.b32.xlu1 %v104_v4, %s135_s20  ;;  %vm69_vm11 = vcmask 195744   ;;  %vm75_vm12 = vcmask 162944   ;;  %vm81_vm13 = vcmask 130144   ;;  %vm87_vm14 = vcmask 97344  }
   0xb   :  { %37 = vrot.lane.b32.xlu2 %v106_v5, %s136_s23  ;;  %vm93_vm15 = vcmask 64544  }
  0x12   :  { %43 = vrot.lane.b32.xlu0 %v107_v6, %s137_s28  ;;  %49 = vrot.lane.b32.xlu1 %v108_v7, %s138_s29 }
  0x13   :  { %55 = vrot.lane.b32.xlu2 %v109_v8, %s139_s3 }
  0x1a   :  { %61 = vrot.lane.b32.xlu0 %v110_v9, %s140_s8  ;;  %67 = vrot.lane.b32.xlu1 %v111_v10, %s141_s9 }
  0x1b   :  { %73 = vrot.lane.b32.xlu2 %v112_v11, %s142_s12 }
  0x22   :  { %79 = vrot.lane.b32.xlu0 %v113_v12, %s143_s17  ;;  %85 = vrot.lane.b32.xlu1 %v114_v13, %s144_s18 }
  0x23   :  { %91 = vrot.lane.b32.xlu2 %v115_v14, %s145_s21 }
  0x5d   :  { %v32_v16 = vpop.permute.xlu2 %31  }
  0x65   :  { %v38_v17 = vpop.permute.xlu2 %37  }
  0x6d   :  { %v56_v18 = vpop.permute.xlu2 %55  }
  0x74   :  { %v8_v19 = vpop.permute.xlu0 %7   ;;  %v20_v20 = vpop.permute.xlu1 %19  }
  0x75   :  { %10 = vst.msk [vmem:[#allocation0] sm:$0x1] %vm9_vm1, %v8_v19   ;;  %v74_v21 = vpop.permute.xlu2 %73  }
  0x7c   :  { %v14_v22 = vpop.permute.xlu0 %13   ;;  %v26_v23 = vpop.permute.xlu1 %25  }
  0x7d   :  { %16 = vst.msk [vmem:[#allocation0] sm:$0x1] %vm15_vm2, %v14_v22   ;;  %v92_v24 = vpop.permute.xlu2 %91  }
  0x7e   :  { %22 = vst.msk [vmem:[#allocation0] sm:$0x1] %vm21_vm3, %v20_v20  }
  0x7f   :  { %28 = vst.msk [vmem:[#allocation0] sm:$0x1] %vm27_vm4, %v26_v23  }
  0x80   :  { %34 = vst.msk [vmem:[#allocation0] sm:$0x1] %vm33_vm5, %v32_v16  }
  0x81   :  { %40 = vst.msk [vmem:[#allocation0] sm:$0x1] %vm39_vm6, %v38_v17  }
  0x84   :  { %v44_v25 = vpop.permute.xlu0 %43   ;;  %v50_v26 = vpop.permute.xlu1 %49  }
  0x85   :  { %46 = vst.msk [vmem:[#allocation0] sm:$0x1] %vm45_vm7, %v44_v25  }
  0x86   :  { %52 = vst.msk [vmem:[#allocation0] sm:$0x1] %vm51_vm8, %v50_v26  }
  0x87   :  { %58 = vst.msk [vmem:[#allocation0] sm:$0x1] %vm57_vm9, %v56_v18  }
  0x8c   :  { %v62_v27 = vpop.permute.xlu0 %61   ;;  %v68_v28 = vpop.permute.xlu1 %67  }
  0x8d   :  { %64 = vst.msk [vmem:[#allocation0] sm:$0x1] %vm63_vm10, %v62_v27  }
  0x8e   :  { %70 = vst.msk [vmem:[#allocation0] sm:$0x1] %vm69_vm11, %v68_v28  }
  0x8f   :  { %76 = vst.msk [vmem:[#allocation0] sm:$0x1] %vm75_vm12, %v74_v21  }
  0x94   :  { %v80_v29 = vpop.permute.xlu0 %79   ;;  %v86_v30 = vpop.permute.xlu1 %85  }
  0x95   :  { %82 = vst.msk [vmem:[#allocation0] sm:$0x1] %vm81_vm13, %v80_v29  }
  0x96   :  { %88 = vst.msk [vmem:[#allocation0] sm:$0x1] %vm87_vm14, %v86_v30  }
  0x97   :  { %94 = vst.msk [vmem:[#allocation0] sm:$0x1] %vm93_vm15, %v92_v24  }
  0x9e   :  { %v97_v31 = vld [vmem:[#allocation0] sm:$0x1] }
  0x9f   :  { %100 = vst [vmem:[%s208_s1] sm:$0x1] %v97_v31 }

// kernel: tile.28
= control target key start
LH: loop header
LB: loop body
LE: loop exit
PB: predicated region body
PF: predicated region fallthrough
CT: control target
= control target key end

     0   :  { %s28_s0 = inlined_call_operand.vmem [shape: f32[16], index: 0, kind: input, shape index: {}]   ;;  %s29_s1 = inlined_call_operand.vmem [shape: f32[16,16], index: 1, kind: output, shape index: {}]  }
   0x1   :  { %v4_v0 = vld [vmem:[%s28_s0] ss:$0 sm:$0xff] }
   0x2   :  { %5 = vst [vmem:[%s29_s1] sm:$0xff] %v4_v0 }
   0x3   :  { %8 = vst [vmem:[%s29_s1 + $0x8] sm:$0xff] %v4_v0 }

// kernel: tile.29
= control target key start
LH: loop header
LB: loop body
LE: loop exit
PB: predicated region body
PF: predicated region fallthrough
CT: control target
= control target key end

     0   :  { %s7_s6 = smov 3  ;;  %s21_s9 = smov 3  ;;  %vm4_vm0 = vcmask 130048   ;;  %vm11_vm1 = vcmask 1048448   ;;  %vm18_vm2 = vcmask 917248   ;;  %vm25_vm3 = vcmask 786048   ;;  %s129_s0 = inlined_call_operand.vmem [shape: f32[16,16], index: 0, kind: input, shape index: {}]   ;;  %s130_s1 = inlined_call_operand.vmem [shape: f32[1,256], index: 1, kind: output, shape index: {}]  }
   0x1   :  { %v67_v0 = vld [vmem:[%s129_s0 + $0x7] ss:$8 sm:%s7_s6]   ;;  %s82_s10 = smov 112   ;;  %v69_v1 = vld [vmem:[%s129_s0 + $0x5] ss:$8 sm:%s21_s9]   ;;  %s83_s13 = smov 80  }
   0x2   :  { %9 = vrot.lane.b32.xlu0 %v67_v0, %s82_s10  ;;  %23 = vrot.lane.b32.xlu1 %v69_v1, %s83_s13  ;;  %s14_s14 = smov 3  ;;  %s28_s15 = smov 3  ;;  %vm32_vm4 = vcmask 654848   ;;  %vm39_vm5 = vcmask 523648   ;;  %vm46_vm6 = vcmask 392448   ;;  %vm53_vm7 = vcmask 261248  }
   0x3   :  { %s35_s16 = smov 3  ;;  %v68_v3 = vld [vmem:[%s129_s0 + $0x6] ss:$8 sm:%s14_s14]   ;;  %s84_s21 = smov 48   ;;  %v70_v4 = vld [vmem:[%s129_s0 + $0x4] ss:$8 sm:%s28_s15]  }
   0x4   :  { %v71_v2 = vld [vmem:[%s129_s0 + $0x3] ss:$8 sm:%s35_s16]   ;;  %s42_s24 = smov 3  ;;  %s85_s25 = smov 96  }
   0x5   :  { %37 = vrot.lane.b32.xlu2 %v71_v2, %s84_s21  ;;  %s86_s26 = smov 64   ;;  %s49_s27 = smov 3  ;;  %v72_v5 = vld [vmem:[%s129_s0 + $0x2] ss:$8 sm:%s42_s24]  }
   0x6   :  { %v73_v6 = vld [vmem:[%s129_s0 + $0x1] ss:$8 sm:%s49_s27]   ;;  %s87_s3 = smov 32   ;;  %s88_s4 = smov 16  }
   0x7   :  { %s2_s5 = smov 3 }
   0x8   :  { %v3_v7 = vld [vmem:[%s129_s0] ss:$8 sm:%s2_s5]  }
   0x9   :  { %5 = vst.msk [vmem:[#allocation0] ss:$8 sm:$0x3] %vm4_vm0, %v3_v7  }
   0xa   :  { %16 = vrot.lane.b32.xlu0 %v68_v3, %s85_s25  ;;  %30 = vrot.lane.b32.xlu1 %v70_v4, %s86_s26 }
   0xd   :  { %44 = vrot.lane.b32.xlu2 %v72_v5, %s87_s3 }
  0x12   :  { %51 = vrot.lane.b32.xlu0 %v73_v6, %s88_s4 }
  0x5f   :  { %v38_v8 = vpop.permute.xlu2 %37  }
  0x67   :  { %v45_v9 = vpop.permute.xlu2 %44  }
  0x74   :  { %v10_v10 = vpop.permute.xlu0 %9   ;;  %v24_v11 = vpop.permute.xlu1 %23  }
  0x75   :  { %12 = vst.msk [vmem:[#allocation0] ss:$8 sm:$0x3] %vm11_vm1, %v10_v10  }
  0x7c   :  { %v17_v12 = vpop.permute.xlu0 %16   ;;  %v31_v13 = vpop.permute.xlu1 %30  }
  0x7d   :  { %19 = vst.msk [vmem:[#allocation0] ss:$8 sm:$0x3] %vm18_vm2, %v17_v12  }
  0x7e   :  { %26 = vst.msk [vmem:[#allocation0] ss:$8 sm:$0x3] %vm25_vm3, %v24_v11  }
  0x7f   :  { %33 = vst.msk [vmem:[#allocation0] ss:$8 sm:$0x3] %vm32_vm4, %v31_v13  }
  0x80   :  { %40 = vst.msk [vmem:[#allocation0] ss:$8 sm:$0x3] %vm39_vm5, %v38_v8  }
  0x81   :  { %47 = vst.msk [vmem:[#allocation0] ss:$8 sm:$0x3] %vm46_vm6, %v45_v9  }
  0x84   :  { %v52_v14 = vpop.permute.xlu0 %51  }
  0x85   :  { %54 = vst.msk [vmem:[#allocation0] ss:$8 sm:$0x3] %vm53_vm7, %v52_v14  }
  0x8c   :  { %v57_v15 = vld [vmem:[#allocation0] sm:$0x1]  ;;  %v62_v16 = vld [vmem:[#allocation0 + $0x8] sm:$0x1] }
  0x8d   :  { %60 = vst [vmem:[%s130_s1] sm:$0x1] %v57_v15 }
  0x8e   :  { %74 = vst [vmem:[%s130_s1 + $0x1] sm:$0x1] %v62_v16 }

// kernel: bottleneck_forward.1
= control target key start
LH: loop header
LB: loop body
LE: loop exit
PB: predicated region body
PF: predicated region fallthrough
CT: control target
= control target key end

     0   :  { %s3527_s27 = smov 0   ;;  %s4465_s0 = inlined_call_operand.vmem [shape: bf16[2,36,384], index: 0, kind: input, shape index: {}]   ;;  %s4466_s1 = inlined_call_operand.vmem [shape: f32[34,1], index: 1, kind: input, shape index: {}]   ;;  %s4467_s2 = inlined_call_operand.vmem [shape: bf16[3,384,64], index: 2, kind: input, shape index: {}]   ;;  %s4468_s3 = inlined_call_operand.vmem [shape: f32[1,64], index: 3, kind: input, shape index: {}]   ;;  %s4469_s4 = inlined_call_operand.vmem [shape: bf16[3,128,64], index: 4, kind: input, shape index: {}]   ;;  %s4470_s5 = inlined_call_operand.vmem [shape: f32[1,64], index: 5, kind: input, shape index: {}]   ;;  %s4471_s6 = inlined_call_operand.vmem [shape: bf16[3,128,256], index: 6, kind: input, shape index: {}]   ;;  %s4472_s7 = inlined_call_operand.vmem [shape: f32[1,256], index: 7, kind: input, shape index: {}]   ;;  %s4473_s8 = inlined_call_operand.vmem [shape: f32[2,36,256], index: 8, kind: output, shape index: {}]  }
   0x1 LB: > { %s2481_s28 = sadd.s32 4294967295, %s3478_s27   ;;  %p2485_p0 = scmp.ge.s32.totalorder %s3478_s27, 1  ;;  %s3478_s27 = sphi %s3527_s27, %s18_s27  }
   0x2   : > { %p262_p1 = scmp.lt.s32.totalorder %s3478_s27, 3 }
   0x4   : > { %p263_p2 = pnand %p2485_p0, %p262_p1 }
   0x5   : > { %p296_p3 = scmp.lt.s32.totalorder (!%p263_p2), %s2481_s28, 1 }
   0x6   : > { %266 = sbr.rel (%p263_p2) target bundleno = 737 (0x2e1), region = 52 }
   0xb   : > { %v3290_v0 = vld [vmem:[%s4467_s2 + $0xf8] sm:$0xff]  ;;  %v3289_v2 = vld [vmem:[%s4467_s2 + $0xf0] sm:$0xff]  ;;  %s4481_s28 = smov (!%p296_p3, %s2481_s28), 1  ;;  %v3288_v4 = vld [vmem:[%s4467_s2 + $0xe8] sm:$0xff]  ;;  %vm465_vm0 = vsmask.f32 7424 }
   0xc   : > { %v3298_v1 = vld [vmem:[%s4467_s2 + $0x138] sm:$0xff]  ;;  %688 = vmatpush.bf16.msra.mxu0 %v3290_v0  ;;  %3419 = vmatpush.bf16.msra.mxu2 %v3290_v0  ;;  %v3297_v3 = vld [vmem:[%s4467_s2 + $0x130] sm:$0xff]  ;;  %s3435_s15 = smul.u32 60, %s4481_s28  ;;  %v3296_v5 = vld [vmem:[%s4467_s2 + $0x128] sm:$0xff]  ;;  %vm1046_vm1 = vcmask 1046528   ;;  %vm1414_vm3 = vcmask 519168  }
   0xd   : > { %711 = vmatpush.bf16.msra.mxu1 %v3298_v1  ;;  %3427 = vmatpush.bf16.msra.mxu3 %v3298_v1  ;;  %v3287_v8 = vld [vmem:[%s4467_s2 + $0xe0] sm:$0xff]  ;;  %v3286_v16 = vld [vmem:[%s4467_s2 + $0xd8] sm:$0xff]  ;;  %v3285_v26 = vld [vmem:[%s4467_s2 + $0xd0] sm:$0xff]  ;;  %vm1415_vm4 = vsmask.f32 7938  ;;  %vm1424_vm13 = vcmask 517120  }
   0xe   : > { %s3556_s20 = scalar_lea.vmem %s4465_s0, %s3435_s15  ;;  %v3295_v12 = vld [vmem:[%s4467_s2 + $0x120] sm:$0xff]  ;;  %v3294_v18 = vld [vmem:[%s4467_s2 + $0x118] sm:$0xff]  ;;  %v3293_v29 = vld [vmem:[%s4467_s2 + $0x110] sm:$0xff]  ;;  %vm1363_vm7 = vsmask.f32 256  ;;  %s3436_s15 = smul.u32 80, %s4481_s28 }
   0xf   : > { %v322_v6 = vld [vmem:[%s3556_s20] sm:$0xff]  ;;  %v3563_v7 = vld [vmem:[%s3556_s20 + $0xc] sm:$0xff]  ;;  %v2538_v19 = vld [vmem:[%s3556_s20 + $0x18] sm:$0xf]  ;;  %vm1364_vm8 = vsmask.f32 4368 }
  0x10   : > { %689 = vmatpush.bf16.msra.mxu0 %v3289_v2  ;;  %3420 = vmatpush.bf16.msra.mxu2 %v3289_v2  ;;  %v441_v9 = vunpack.c.l.b16 %v322_v6  ;;  %v444_v10 = vunpack.c.l.b16 %v3563_v7  ;;  %v380_v11 = vld [vmem:[%s3556_s20 + $0x30] sm:$0x33]  ;;  %v442_v13 = vunpack.c.h.b16 %v322_v6  ;;  %v445_v14 = vunpack.c.h.b16 %v3563_v7  ;;  %v3257_v20 = vld [vmem:[%s3556_s20 + $0x20] sm:$0xf0]  ;;  %v3256_v23 = vld [vmem:[%s3556_s20 + $0x1c] sm:$0xf]  ;;  %s4421_s18 = scalar_lea.vmem %s4473_s8, %s3436_s15 }
  0x11   : > { %712 = vmatpush.bf16.msra.mxu1 %v3297_v3  ;;  %3428 = vmatpush.bf16.msra.mxu3 %v3297_v3  ;;  %v453_v15 = vunpack.c.l.b16 %v380_v11  ;;  %v454_v22 = vunpack.c.h.b16 %v380_v11  ;;  %v2540_v24 = vld [vmem:[%s3556_s20 + $0x24] sm:$0xf0]  ;;  %v3597_v27 = vor.u32 %v3257_v20, %v2538_v19  ;;  %v3283_v45 = vld [vmem:[%s4467_s2 + $0xc0] sm:$0xff]  ;;  %v3306_v53 = vld [vmem:[%s4467_s2 + $0x178] sm:$0xff]  ;;  %vm1425_vm14 = vsmask.f32 1280 }
  0x12   : > { %v3579_v17 = vpack.c.b16 %v444_v10, %v441_v9  ;;  %v3588_v21 = vpack.c.b16 %v445_v14, %v442_v13  ;;  %v3603_v30 = vor.u32 %v3256_v23, %v2540_v24  ;;  %v3284_v34 = vld [vmem:[%s4467_s2 + $0xc8] sm:$0xff]  ;;  %v3291_v48 = vld [vmem:[%s4467_s2 + $0x100] sm:$0xff]  ;;  %v3266_v54 = vld [vmem:[%s4467_s2 + $0x38] sm:$0xff] }
  0x13   : > { %v3592_v25 = vpack.c.b16 %v453_v15, %v453_v15  ;;  %v3606_v32 = vpack.c.b16 %v454_v22, %v454_v22  ;;  %v474_v37 = vshll.u32 %v3597_v27, 16  ;;  %v3292_v38 = vld [vmem:[%s4467_s2 + $0x108] sm:$0xff]  ;;  %v3274_v57 = vld [vmem:[%s4467_s2 + $0x78] sm:$0xff]  ;;  %v3305_v61 = vld [vmem:[%s4467_s2 + $0x170] sm:$0xff]  ;;  %v502_v6 = vshrl.u32 %v3597_v27, 16 }
  0x14   : > { %690 = vmatpush.bf16.msra.mxu0 %v3288_v4  ;;  %3421 = vmatpush.bf16.msra.mxu2 %v3288_v4  ;;  %v469_v28 = vshll.u32 %v3579_v17, 16  ;;  %v481_v31 = vshll.u32 %v3588_v21, 16  ;;  %v467_v35 = vshrl.u32 %v3579_v17, 16  ;;  %v479_v39 = vshrl.u32 %v3588_v21, 16  ;;  %v3282_v60 = vld [vmem:[%s4467_s2 + $0xb8] sm:$0xff]  ;;  %v3265_v62 = vld [vmem:[%s4467_s2 + $0x30] sm:$0xff]  ;;  %vm3989_vm6 = vmand %vm1414_vm3, %vm1415_vm4 }
  0x15   : > { %713 = vmatpush.bf16.msra.mxu1 %v3296_v5  ;;  %3429 = vmatpush.bf16.msra.mxu3 %v3296_v5  ;;  %v506_v33 = vshll.u32 %v3592_v25, 16  ;;  %v486_v41 = vshll.u32 %v3603_v30, 16  ;;  %v514_v42 = vshll.u32 %v3606_v32, 16  ;;  %v526_v44 = vshrl.u32 %v3592_v25, 16  ;;  %v3273_v63 = vld [vmem:[%s4467_s2 + $0x70] sm:$0xff]  ;;  %v3304_v1 = vld [vmem:[%s4467_s2 + $0x168] sm:$0xff]  ;;  %vm4015_vm10 = vmor %vm1363_vm7, %vm1364_vm8 }
  0x16   : > { %v471_v36 = vrot.slane %v469_v28, 1  ;;  %v483_v40 = vrot.slane %v481_v31, 1  ;;  %v476_v47 = vrot.slane %v474_v37, 1  ;;  %v529_v52 = vshrl.u32 %v3606_v32, 16  ;;  %v3281_v0 = vld [vmem:[%s4467_s2 + $0xb0] sm:$0xff]  ;;  %v3264_v2 = vld [vmem:[%s4467_s2 + $0x28] sm:$0xff]  ;;  %vm4036_vm15 = vmand %vm1424_vm13, %vm1425_vm14 }
  0x17   : > { %v3620_v43 = vrot.slane %v506_v33, 1  ;;  %v488_v50 = vrot.slane %v486_v41, 1  ;;  %v516_v51 = vrot.slane %v514_v42, 1  ;;  %v323_v3 = vld [vmem:[%s3556_s20 + $0x8] sm:$0xf]  ;;  %v3303_v11 = vld [vmem:[%s4467_s2 + $0x160] sm:$0xff] }
  0x18   : > { %691 = vmatpush.bf16.msra.mxu0 %v3287_v8  ;;  %3422 = vmatpush.bf16.msra.mxu2 %v3287_v8  ;;  %v472_v46 = vor.u32 %v471_v36, %v467_v35  ;;  %v484_v49 = vor.u32 %v483_v40, %v479_v39  ;;  %v3665_v4 = vld [vmem:[%s3556_s20 + $0x14] sm:$0xf]  ;;  %v3272_v5 = vld [vmem:[%s4467_s2 + $0x68] sm:$0xff]  ;;  %v510_v8 = vshrl.u32 %v3603_v30, 16  ;;  %v443_v13 = vunpack.c.l.b16 %v323_v3  ;;  %v3279_v20 = vld [vmem:[%s4467_s2 + $0xa0] sm:$0xff] }
  0x19   : > { %714 = vmatpush.bf16.msra.mxu1 %v3295_v12  ;;  %3430 = vmatpush.bf16.msra.mxu3 %v3295_v12  ;;  %v528_v55 = vor.u32 %v526_v44, %v3620_v43  ;;  %v531_v59 = vor.u32 %v529_v52, %v516_v51  ;;  %v3280_v9 = vld [vmem:[%s4467_s2 + $0xa8] sm:$0xff]  ;;  %v3263_v12 = vld [vmem:[%s4467_s2 + $0x20] sm:$0xff]  ;;  %v446_v15 = vunpack.c.l.b16 %v3665_v4  ;;  %v3302_v22 = vld [vmem:[%s4467_s2 + $0x158] sm:$0xff]  ;;  %v1056_v4 = vrot.slane %v3592_v25, 1 }
  0x1a   : > { %v477_v56 = vsel %vm465_vm0, %v472_v46, %v476_v47  ;;  %v489_v58 = vsel %vm465_vm0, %v484_v49, %v488_v50  ;;  %v512_v19 = vor.u32 %v510_v8, %v488_v50  ;;  %v3262_v23 = vld [vmem:[%s4467_s2 + $0x18] sm:$0xff]  ;;  %v3258_v28 = vld [vmem:[%s3556_s20 + $0x28] sm:$0xf0]  ;;  %v3301_v35 = vld [vmem:[%s4467_s2 + $0x150] sm:$0xff] }
  0x1b   : > { %v3696_v24 = vpack.c.b16 %v446_v15, %v443_v13  ;;  %v3270_v31 = vld [vmem:[%s4467_s2 + $0x58] sm:$0xff]  ;;  %v3261_v36 = vld [vmem:[%s4467_s2 + $0x10] sm:$0xff]  ;;  %v3300_v41 = vld [vmem:[%s4467_s2 + $0x148] sm:$0xff] }
  0x1c   : > { %692 = vmatpush.bf16.msra.mxu0 %v3286_v16  ;;  %3423 = vmatpush.bf16.msra.mxu2 %v3286_v16  ;;  %v3271_v16 = vld [vmem:[%s4467_s2 + $0x60] sm:$0xff]  ;;  %v517_v33 = vsel %vm465_vm0, %v512_v19, %v516_v51  ;;  %v3269_v39 = vld [vmem:[%s4467_s2 + $0x50] sm:$0xff]  ;;  %v3260_v42 = vld [vmem:[%s4467_s2 + $0x8] sm:$0xff] }
  0x1d   : > { %715 = vmatpush.bf16.msra.mxu1 %v3294_v18  ;;  %3431 = vmatpush.bf16.msra.mxu3 %v3294_v18  ;;  %v504_v18 = vor.u32 %v502_v6, %v476_v47  ;;  %v3277_v40 = vld [vmem:[%s4467_s2 + $0x90] sm:$0xff]  ;;  %v3268_v46 = vld [vmem:[%s4467_s2 + $0x48] sm:$0xff]  ;;  %v3259_v49 = vld [vmem:[%s4467_s2] sm:$0xff] }
  0x1e   : > { %v3276_v47 = vld [vmem:[%s4467_s2 + $0x88] sm:$0xff]  ;;  %v3314_v52 = vld [vmem:[%s4467_s2 + $0x1b8] sm:$0xff]  ;;  %v3311_v3 = vld [vmem:[%s4467_s2 + $0x1a0] sm:$0xff] }
  0x1f   : > { %v3317_v19 = vld [vmem:[%s4467_s2 + $0x1d0] sm:$0xff]  ;;  %v310_v25 = vld [vmem:[%s4466_s1 + $0x18] sm:$0xff] }
  0x20   : > { %693 = vmatpush.bf16.msra.mxu0 %v3285_v26  ;;  %3424 = vmatpush.bf16.msra.mxu2 %v3285_v26  ;;  %v2546_v26 = vld [vmem:[%s3556_s20 + $0x20] sm:$0xf] }
  0x21   : > { %716 = vmatpush.bf16.msra.mxu1 %v3293_v29  ;;  %3432 = vmatpush.bf16.msra.mxu3 %v3293_v29  ;;  %v509_v29 = vsel %vm465_vm0, %v504_v18, %v3620_v43  ;;  %v3715_v37 = vor.u32 %v3258_v28, %v2546_v26  ;;  %v491_v43 = vshrl.u32 %v3696_v24, 16  ;;  %v3309_v18 = vld [vmem:[%s4467_s2 + $0x190] sm:$0xff]  ;;  %v3324_v26 = vld [vmem:[%s4467_s2 + $0x208] sm:$0xff]  ;;  %v3307_v28 = vld [vmem:[%s4467_s2 + $0x180] sm:$0xff] }
  0x24   : > { %694 = vmatpush.bf16.msra.mxu0 %v3284_v34  ;;  %3425 = vmatpush.bf16.msra.mxu2 %v3284_v34  ;;  %v3278_v34 = vld [vmem:[%s4467_s2 + $0x98] sm:$0xff] }
  0x25   : > { %717 = vmatpush.bf16.msra.mxu1 %v3292_v38  ;;  %3433 = vmatpush.bf16.msra.mxu3 %v3292_v38  ;;  %v493_v38 = vshll.u32 %v3696_v24, 16 }
  0x27   : > { %v495_v44 = vrot.slane %v493_v38, 1 }
  0x28   : > { %695 = vmatpush.bf16.msra.mxu0 %v3283_v45  ;;  %3426 = vmatpush.bf16.msra.mxu2 %v3283_v45  ;;  %v498_v45 = vshll.u32 %v3715_v37, 16 }
  0x29   : > { %718 = vmatpush.bf16.msra.mxu1 %v3291_v48  ;;  %3434 = vmatpush.bf16.msra.mxu3 %v3291_v48  ;;  %v3299_v48 = vld [vmem:[%s4467_s2 + $0x140] sm:$0xff]  ;;  %v496_v50 = vor.u32 %v495_v44, %v491_v43  ;;  %v988_v44 = vld [vmem:[%s3556_s20 + $0x8] sm:$0xe] }
  0x2a   : > { %v500_v51 = vrot.slane %v498_v45, 1 }
  0x2b   : > { %696 = vmatmul.bf16.vlgmr.msra.gmra.mxu0 %v477_v56  ;;  %706 = vmatmul.bf16.vlgmr.msra.gmra.mxu2 %v528_v55  ;;  %v3267_v55 = vld [vmem:[%s4467_s2 + $0x40] sm:$0xff] }
  0x2c   : > { %734 = vmatpush.bf16.msrb.mxu2 %v3306_v53  ;;  %719 = vmatmul.bf16.vlgmr.msra.gmra.mxu1 %v489_v58  ;;  %v3322_v53 = vld [vmem:[%s4467_s2 + $0x1f8] sm:$0xff]  ;;  %v501_v56 = vsel %vm465_vm0, %v496_v50, %v500_v51  ;;  %v3275_v58 = vld [vmem:[%s4467_s2 + $0x80] sm:$0xff] }
  0x2d   : > { %918 = vmatpush.bf16.msrb.mxu3 %v3266_v54  ;;  %941 = vmatpush.bf16.msrb.mxu0 %v3274_v57  ;;  %v381_v54 = vld [vmem:[%s3556_s20 + $0x38] sm:$0x3] }
  0x2e   : > { %729 = vmatmul.bf16.vlgmr.msra.gmra.mxu3 %v531_v59  ;;  %964 = vmatpush.bf16.msrb.mxu1 %v3282_v60  ;;  %v3330_v57 = vld [vmem:[%s4467_s2 + $0x238] sm:$0xff]  ;;  %v455_v59 = vunpack.c.l.b16 %v381_v54  ;;  %v3313_v60 = vld [vmem:[%s4467_s2 + $0x1b0] sm:$0xff]  ;;  %v1051_v54 = vrot.slane %v3603_v30, 1 }
  0x30   : > { %735 = vmatpush.bf16.msrb.mxu2 %v3305_v61  ;;  %v3321_v61 = vld [vmem:[%s4467_s2 + $0x1f0] sm:$0xff] }
  0x31   : > { %919 = vmatpush.bf16.msrb.mxu3 %v3265_v62  ;;  %942 = vmatpush.bf16.msrb.mxu0 %v3273_v63  ;;  %v3329_v62 = vld [vmem:[%s4467_s2 + $0x230] sm:$0xff]  ;;  %v3771_v63 = vpack.c.b16 %v455_v59, %v455_v59 }
  0x32   : > { %965 = vmatpush.bf16.msrb.mxu1 %v3281_v0  ;;  %v3312_v0 = vld [vmem:[%s4467_s2 + $0x1a8] sm:$0xff] }
  0x34   : > { %736 = vmatpush.bf16.msrb.mxu2 %v3304_v1  ;;  %v518_v1 = vshrl.u32 %v3715_v37, 16 }
  0x35   : > { %920 = vmatpush.bf16.msrb.mxu3 %v3264_v2  ;;  %943 = vmatpush.bf16.msrb.mxu0 %v3272_v5  ;;  %v522_v2 = vshll.u32 %v3771_v63, 16  ;;  %v3319_v5 = vld [vmem:[%s4467_s2 + $0x1e0] sm:$0xff] }
  0x36   : > { %966 = vmatpush.bf16.msrb.mxu1 %v3280_v9  ;;  %v520_v6 = vor.u32 %v518_v1, %v500_v51  ;;  %v3327_v9 = vld [vmem:[%s4467_s2 + $0x220] sm:$0xff] }
  0x37   : > { %v524_v8 = vrot.slane %v522_v2, 1 }
  0x38   : > { %737 = vmatpush.bf16.msrb.mxu2 %v3303_v11  ;;  %v3310_v11 = vld [vmem:[%s4467_s2 + $0x198] sm:$0xff] }
  0x39   : > { %921 = vmatpush.bf16.msrb.mxu3 %v3263_v12  ;;  %944 = vmatpush.bf16.msrb.mxu0 %v3271_v16  ;;  %v3318_v12 = vld [vmem:[%s4467_s2 + $0x1d8] sm:$0xff]  ;;  %v525_v13 = vsel %vm465_vm0, %v520_v6, %v524_v8 }
  0x3a   : > { %967 = vmatpush.bf16.msrb.mxu1 %v3279_v20  ;;  %v3326_v16 = vld [vmem:[%s4467_s2 + $0x218] sm:$0xff]  ;;  %v3325_v20 = vld [vmem:[%s4467_s2 + $0x210] sm:$0xff] }
  0x3b   : > { %701 = vmatmul.bf16.gmra.mxu0 %v509_v29  ;;  %v3315_v29 = vld [vmem:[%s4467_s2 + $0x1c0] sm:$0xff] }
  0x3c   : > { %738 = vmatpush.bf16.msrb.mxu2 %v3302_v22  ;;  %724 = vmatmul.bf16.gmra.mxu1 %v517_v33  ;;  %v3308_v22 = vld [vmem:[%s4467_s2 + $0x188] sm:$0xff] }
  0x3d   : > { %922 = vmatpush.bf16.msrb.mxu3 %v3262_v23  ;;  %945 = vmatpush.bf16.msrb.mxu0 %v3270_v31  ;;  %v3316_v23 = vld [vmem:[%s4467_s2 + $0x1c8] sm:$0xff]  ;;  %v532_v31 = vshrl.u32 %v3771_v63, 16 }
  0x3e   : > { %968 = vmatpush.bf16.msrb.mxu1 %v3278_v34  ;;  %v331_v34 = vld [vmem:[%s3556_s20 + $0x38] sm:$0x1] }
  0x3f   : > { %v534_v38 = vor.u32 %v532_v31, %v524_v8 }
  0x40   : > { %739 = vmatpush.bf16.msrb.mxu2 %v3301_v35  ;;  %v3323_v35 = vld [vmem:[%s4467_s2 + $0x200] sm:$0xff] }
  0x41   : > { %923 = vmatpush.bf16.msrb.mxu3 %v3261_v36  ;;  %946 = vmatpush.bf16.msrb.mxu0 %v3269_v39 }
  0x42   : > { %969 = vmatpush.bf16.msrb.mxu1 %v3277_v40  ;;  %v761_v40 = vunpack.c.l.b16 %v331_v34 }
  0x44   : > { %740 = vmatpush.bf16.msrb.mxu2 %v3300_v41  ;;  %v764_v43 = vpack.c.b16 %v761_v40, %v761_v40 }
  0x45   : > { %924 = vmatpush.bf16.msrb.mxu3 %v3260_v42  ;;  %947 = vmatpush.bf16.msrb.mxu0 %v3268_v46  ;;  %v987_v42 = vld [vmem:[%s3556_s20] sm:$0xee] }
  0x46   : > { %970 = vmatpush.bf16.msrb.mxu1 %v3276_v47  ;;  %v1040_v45 = vunpack.c.l.b16 %v987_v42  ;;  %v1041_v46 = vunpack.c.h.b16 %v987_v42  ;;  %v1042_v47 = vunpack.c.l.b16 %v988_v44 }
  0x48   : > { %741 = vmatpush.bf16.msrb.mxu2 %v3299_v48  ;;  %v1043_v48 = vpack.c.b16 %v444_v10, %v1040_v45  ;;  %v1045_v50 = vpack.c.b16 %v446_v15, %v1042_v47  ;;  %v1058_v15 = vrot.slane %v3606_v32, 1  ;;  %v3338_v45 = vld [vmem:[%s4469_s4 + $0x30] sm:$0xff] }
  0x49   : > { %925 = vmatpush.bf16.msrb.mxu3 %v3259_v49  ;;  %948 = vmatpush.bf16.msrb.mxu0 %v3267_v55  ;;  %v1044_v49 = vpack.c.b16 %v445_v14, %v1041_v46  ;;  %v307_v14 = vld [vmem:[%s4466_s1] sm:$0xff] }
  0x4a   : > { %971 = vmatpush.bf16.msrb.mxu1 %v3275_v58  ;;  %v1047_v51 = vrot.slane %v1043_v48, 1  ;;  %v1053_v55 = vrot.slane %v1045_v50, 1  ;;  %v1060_v58 = vrot.slane %v3771_v63, 1  ;;  %v3337_v50 = vld [vmem:[%s4469_s4 + $0x28] sm:$0xff] }
  0x4b   : > { %742 = vmatmul.bf16.vlgmr.msrb.gmra.mxu2 %v501_v56  ;;  %v1054_v56 = vrot.slane %v3715_v37, 1 }
  0x4c   : > { %1215 = vmatpush.bf16.msra.mxu2 %v3314_v52  ;;  %926 = vmatmul.bf16.vlgmr.msrb.gmra.mxu3 %v3579_v17  ;;  %v3320_v17 = vld [vmem:[%s4467_s2 + $0x1e8] sm:$0xff]  ;;  %v1048_v52 = vrot.slane %v3597_v27, 1 }
  0x4d   : > { %1238 = vmatpush.bf16.msra.mxu3 %v3322_v53  ;;  %1261 = vmatpush.bf16.msra.mxu0 %v3330_v57  ;;  %v1050_v53 = vrot.slane %v1044_v49, 1  ;;  %v1055_v7 = vsel %vm1046_vm1, %v1053_v55, %v1054_v56 }
  0x4e   : > { %949 = vmatmul.bf16.vlgmr.msrb.gmra.mxu0 %v3588_v21  ;;  %972 = vmatmul.bf16.vlgmr.msrb.gmra.mxu1 %v3696_v24  ;;  %v3328_v21 = vld [vmem:[%s4467_s2 + $0x228] sm:$0xff]  ;;  %v330_v24 = vld [vmem:[%s3556_s20 + $0x30] sm:$0x11]  ;;  %v1049_v57 = vsel %vm1046_vm1, %v1047_v51, %v1048_v52  ;;  %v1057_v59 = vsel %vm1046_vm1, %v1048_v52, %v1056_v4 }
  0x4f   : > { %v759_v33 = vunpack.c.l.b16 %v330_v24  ;;  %v760_v36 = vunpack.c.h.b16 %v330_v24  ;;  %v1052_v10 = vsel %vm1046_vm1, %v1050_v53, %v1051_v54 }
  0x50   : > { %1216 = vmatpush.bf16.msra.mxu2 %v3313_v60  ;;  %v1059_v60 = vsel %vm1046_vm1, %v1051_v54, %v1058_v15  ;;  %v3336_v54 = vld [vmem:[%s4469_s4 + $0x20] sm:$0xff] }
  0x51   : > { %1239 = vmatpush.bf16.msra.mxu3 %v3321_v61  ;;  %1262 = vmatpush.bf16.msra.mxu0 %v3329_v62  ;;  %v762_v39 = vpack.c.b16 %v759_v33, %v759_v33  ;;  %v763_v41 = vpack.c.b16 %v760_v36, %v760_v36  ;;  %v1061_v61 = vsel %vm1046_vm1, %v1054_v56, %v1060_v58 }
  0x54   : > { %1217 = vmatpush.bf16.msra.mxu2 %v3312_v0 }
  0x55   : > { %1240 = vmatpush.bf16.msra.mxu3 %v3320_v17  ;;  %1263 = vmatpush.bf16.msra.mxu0 %v3328_v21 }
  0x58   : > { %1218 = vmatpush.bf16.msra.mxu2 %v3311_v3 }
  0x59   : > { %1241 = vmatpush.bf16.msra.mxu3 %v3319_v5  ;;  %1264 = vmatpush.bf16.msra.mxu0 %v3327_v9  ;;  %v311_v5 = vld [vmem:[%s4466_s1 + $0x20] sm:$0x3] }
  0x5b   : > { %747 = vmatmul.bf16.gmra.mxu2 %v525_v13 }
  0x5c   : > { %1219 = vmatpush.bf16.msra.mxu2 %v3310_v11  ;;  %931 = vmatmul.bf16.gmra.mxu3 %v3597_v27  ;;  %v309_v27 = vld [vmem:[%s4466_s1 + $0x10] sm:$0xff] }
  0x5d   : > { %1242 = vmatpush.bf16.msra.mxu3 %v3318_v12  ;;  %1265 = vmatpush.bf16.msra.mxu0 %v3326_v16 }
  0x5e   : > { %954 = vmatmul.bf16.gmra.mxu0 %v3603_v30  ;;  %977 = vmatmul.bf16.gmra.mxu1 %v3715_v37  ;;  %v3480_v30 = vmov 0   ;;  %v308_v37 = vld [vmem:[%s4466_s1 + $0x8] sm:$0xff] }
  0x5f   : > { %3447 = vset.pattern.permute.xlu0 %v3480_v30  ;;  %312 = vst [vmem:[#allocation2] sm:$0xf] %v3480_v30  ;;  %3448 = vset.pattern.permute.xlu1 %v3480_v30 }
  0x60   : > { %1220 = vmatpush.bf16.msra.mxu2 %v3309_v18  ;;  %313 = vst [vmem:[#allocation2 + $0x4] sm:$0xf] %v3480_v30  ;;  %1330 = vperm.xlu0 %3447, %v307_v14   ;;  %v3335_v14 = vld [vmem:[%s4469_s4 + $0x18] sm:$0xff] }
  0x61   : > { %1243 = vmatpush.bf16.msra.mxu3 %v3317_v19  ;;  %1266 = vmatpush.bf16.msra.mxu0 %v3325_v20  ;;  %314 = vst [vmem:[#allocation2 + $0x8] sm:$0xf] %v3480_v30 }
  0x62   : > { %1340 = vperm.xlu1 %3448, %v309_v27   ;;  %3449 = vset.pattern.permute.xlu2 %v3480_v30  ;;  %315 = vst [vmem:[#allocation2 + $0xc] sm:$0xf] %v3480_v30  ;;  %v3355_v27 = vld [vmem:[%s4469_s4 + $0xb8] sm:$0xff] }
  0x63   : > { %316 = vst [vmem:[#allocation2 + $0x10] sm:$0x3] %v3480_v30  ;;  %1350 = vperm.xlu2 %3449, %v311_v5  }
  0x64   : > { %1221 = vmatpush.bf16.msra.mxu2 %v3308_v22  ;;  %317 = vst [vmem:[#allocation3] sm:$0xf] %v3480_v30 }
  0x65   : > { %1244 = vmatpush.bf16.msra.mxu3 %v3316_v23  ;;  %1267 = vmatpush.bf16.msra.mxu0 %v3324_v26  ;;  %318 = vst [vmem:[#allocation3 + $0x4] sm:$0xf] %v3480_v30 }
  0x66   : > { %319 = vst [vmem:[#allocation3 + $0x8] sm:$0xf] %v3480_v30 }
  0x67   : > { %320 = vst [vmem:[#allocation3 + $0xc] sm:$0xf] %v3480_v30 }
  0x68   : > { %1222 = vmatpush.bf16.msra.mxu2 %v3307_v28  ;;  %321 = vst [vmem:[#allocation3 + $0x10] sm:$0x3] %v3480_v30  ;;  %1335 = vperm.xlu0 %3447, %v308_v37   ;;  %v3347_v30 = vld [vmem:[%s4469_s4 + $0x78] sm:$0xff] }
  0x69   : > { %1245 = vmatpush.bf16.msra.mxu3 %v3315_v29  ;;  %1268 = vmatpush.bf16.msra.mxu0 %v3323_v35 }
  0x6a   : > { %1345 = vperm.xlu1 %3448, %v310_v25   ;;  %1556 = vmatpush.bf16.msra.mxu1 %v3347_v30  ;;  %v3334_v25 = vld [vmem:[%s4469_s4 + $0x10] sm:$0xff] }
  0x6b   : > { %752 = vmatmul.bf16.gmra.mxu2 %v534_v38  ;;  %v3350_v30 = vld [vmem:[%s4469_s4 + $0x90] sm:$0xff] }
  0x6c   : > { %936 = vmatmul.bf16.gmra.mxu3 %v762_v39 }
  0x6d   : > { %1733 = vmatpush.bf16.msrb.mxu3 %v3355_v27 }
  0x6e   : > { %959 = vmatmul.bf16.gmra.mxu0 %v763_v41  ;;  %982 = vmatmul.bf16.gmra.mxu1 %v764_v43  ;;  %v3339_v43 = vld [vmem:[%s4469_s4 + $0x38] sm:$0xff] }
  0x6f   : > { %1633 = vmatpush.bf16.msrb.mxu2 %v3339_v43 }
  0x73   : > { %1634 = vmatpush.bf16.msrb.mxu2 %v3338_v45 }
  0x77   : > { %1635 = vmatpush.bf16.msrb.mxu2 %v3337_v50 }
  0x7b   : > { %1223 = vmatmul.bf16.vlgmr.msra.gmra.mxu2 %v1049_v57 }
  0x7c   : > { %1246 = vmatmul.bf16.vlgmr.msra.gmra.mxu3 %v1052_v10  ;;  %1636 = vmatpush.bf16.msrb.mxu2 %v3336_v54 }
  0x7e   : > { %1269 = vmatmul.bf16.vlgmr.msra.gmra.mxu0 %v1055_v7 }
  0x80   : > { %1637 = vmatpush.bf16.msrb.mxu2 %v3335_v14 }
  0x84   : > { %1638 = vmatpush.bf16.msrb.mxu2 %v3334_v25 }
  0x8b   : > { %1228 = vmatmul.bf16.gmra.mxu2 %v1057_v59 }
  0x8c   : > { %1251 = vmatmul.bf16.gmra.mxu3 %v1059_v60  ;;  %v3354_v60 = vld [vmem:[%s4469_s4 + $0xb0] sm:$0xff] }
  0x8d   : > { %1734 = vmatpush.bf16.msrb.mxu3 %v3354_v60 }
  0x8e   : > { %1274 = vmatmul.bf16.gmra.mxu0 %v1061_v61 }
  0x9b   : > { %1233 = vmatmul.bf16.gmra.mxu2 %v1056_v4 }
  0x9c   : > { %1256 = vmatmul.bf16.gmra.mxu3 %v1058_v15 }
  0x9e   : > { %1279 = vmatmul.bf16.gmra.mxu0 %v1060_v58  ;;  %v3923_v58 = vld [vmem:[%s4468_s3] ss:$0 sm:$0xff] }
  0xa8   : > { %v697_v32 = vpop.f32.mrf.mxu0 }
  0xa9   : > { %v720_v62 = vpop.f32.mrf.mxu1 }
  0xaa   : > { %v721_v63 = vadd.f32 %v720_v62, %v697_v32 }
  0xae   : > { %v707_v0 = vpop.f32.mrf.mxu2 }
  0xb0   : > { %v699_v17 = vpop.f32.mrf.mxu0 }
  0xb1   : > { %v730_v1 = vpop.f32.mrf.mxu3  ;;  %v722_v2 = vpop.f32.mrf.mxu1 }
  0xb2   : > { %v3870_v21 = vadd.f32 %v730_v1, %v707_v0  ;;  %v723_v53 = vadd.f32 %v722_v2, %v699_v17 }
  0xb6   : > { %v709_v3 = vpop.f32.mrf.mxu2 }
  0xb7   : > { %v3333_v3 = vld [vmem:[%s4469_s4 + $0x8] sm:$0xff] }
  0xb8   : > { %v702_v6 = vpop.f32.mrf.mxu0  ;;  %1639 = vmatpush.bf16.msrb.mxu2 %v3333_v3 }
  0xb9   : > { %v732_v8 = vpop.f32.mrf.mxu3  ;;  %v725_v9 = vpop.f32.mrf.mxu1 }
  0xba   : > { %v726_v11 = vadd.f32 %v725_v9, %v702_v6 }
  0xc0   : > { %v3875_v12 = vpop.f32.mrf.mxu0 }
  0xc1   : > { %v3877_v13 = vpop.f32.mrf.mxu1 }
  0xcb   : > { %v950_v16 = vpop.f32.mrf.mxu0  ;;  %v973_v18 = vpop.f32.mrf.mxu1 }
  0xce   : > { %v743_v19 = vpop.f32.mrf.mxu2 }
  0xcf   : > { %v927_v20 = vpop.f32.mrf.mxu3  ;;  %v744_v47 = vadd.f32 %v743_v19, %v721_v63 }
  0xd1   : > { %v928_v51 = vadd.f32 %v927_v20, %v744_v47  ;;  %v3353_v20 = vld [vmem:[%s4469_s4 + $0xa8] sm:$0xff] }
  0xd2   : > { %1735 = vmatpush.bf16.msrb.mxu3 %v3353_v20 }
  0xd3   : > { %v952_v22 = vpop.f32.mrf.mxu0  ;;  %v975_v23 = vpop.f32.mrf.mxu1  ;;  %v951_v55 = vadd.f32 %v950_v16, %v928_v51  ;;  %v728_v16 = vadd.f32 %v3877_v13, %v3875_v12  ;;  %v3344_v51 = vld [vmem:[%s4469_s4 + $0x60] sm:$0xff] }
  0xd5   : > { %v974_v4 = vadd.f32 %v973_v18, %v951_v55 }
  0xd6   : > { %v745_v24 = vpop.f32.mrf.mxu2 }
  0xd7   : > { %v929_v26 = vpop.f32.mrf.mxu3  ;;  %v746_v56 = vadd.f32 %v745_v24, %v723_v53 }
  0xd9   : > { %v930_v15 = vadd.f32 %v929_v26, %v746_v56 }
  0xdb   : > { %v3879_v28 = vpop.f32.mrf.mxu0  ;;  %v3881_v29 = vpop.f32.mrf.mxu1  ;;  %v953_v32 = vadd.f32 %v952_v22, %v930_v15 }
  0xdd   : > { %v976_v5 = vadd.f32 %v975_v23, %v953_v32  ;;  %v3332_v23 = vld [vmem:[%s4469_s4] sm:$0xff] }
  0xde   : > { %v748_v31 = vpop.f32.mrf.mxu2  ;;  %1640 = vmatpush.bf16.msrb.mxu2 %v3332_v23 }
  0xdf   : > { %v932_v33 = vpop.f32.mrf.mxu3  ;;  %v749_v62 = vadd.f32 %v748_v31, %v726_v11  ;;  %v3346_v11 = vld [vmem:[%s4469_s4 + $0x70] sm:$0xff]  ;;  %v3345_v31 = vld [vmem:[%s4469_s4 + $0x68] sm:$0xff] }
  0xe0   : > { %1557 = vmatpush.bf16.msra.mxu1 %v3346_v11 }
  0xe1   : > { %v933_v6 = vadd.f32 %v932_v33, %v749_v62 }
  0xe3   : > { %v3883_v34 = vpop.f32.mrf.mxu0  ;;  %v3885_v35 = vpop.f32.mrf.mxu1  ;;  %v956_v24 = vadd.f32 %v3879_v28, %v933_v6  ;;  %v3352_v28 = vld [vmem:[%s4469_s4 + $0xa0] sm:$0xff] }
  0xe4   : > { %1558 = vmatpush.bf16.msra.mxu1 %v3345_v31  ;;  %1736 = vmatpush.bf16.msrb.mxu3 %v3352_v28 }
  0xe6   : > { %v3887_v36 = vpop.f32.mrf.mxu2 }
  0xe7   : > { %v3889_v38 = vpop.f32.mrf.mxu3  ;;  %v751_v22 = vadd.f32 %v3887_v36, %v728_v16 }
  0xe8   : > { %1559 = vmatpush.bf16.msra.mxu1 %v3344_v51 }
  0xe9   : > { %v935_v36 = vadd.f32 %v3889_v38, %v751_v22  ;;  %v3348_v22 = vld [vmem:[%s4469_s4 + $0x80] sm:$0xff] }
  0xeb   : > { %v3891_v39 = vpop.f32.mrf.mxu0  ;;  %v3893_v40 = vpop.f32.mrf.mxu1 }
  0xee   : > { %v3895_v41 = vpop.f32.mrf.mxu2 }
  0xef   : > { %v3897_v42 = vpop.f32.mrf.mxu3  ;;  %v754_v53 = vadd.f32 %v3895_v41, %v3870_v21 }
  0xf1   : > { %v938_v27 = vadd.f32 %v3897_v42, %v754_v53 }
  0xf3   : > { %v962_v44 = vpop.f32.mrf.mxu0  ;;  %v985_v46 = vpop.f32.mrf.mxu1 }
  0xf4   : > { %v3953_v44 = vpop.permute.xlu0 %1330  ;;  %v979_v46 = vadd.f32 %v3881_v29, %v956_v24  ;;  %v3351_v29 = vld [vmem:[%s4469_s4 + $0x98] sm:$0xff] }
  0xf5   : > { %1737 = vmatpush.bf16.msrb.mxu3 %v3351_v29 }
  0xf6   : > { %v755_v48 = vpop.f32.mrf.mxu2 }
  0xf7   : > { %v939_v49 = vpop.f32.mrf.mxu3 }
  0xf9   : > { %1738 = vmatpush.bf16.msrb.mxu3 %v3350_v30 }
  0xfb   : > { %v1270_v52 = vpop.f32.mrf.mxu0 }
  0xfc   : > { %v3981_v60 = vpop.permute.xlu0 %1335 }
  0xfe   : > { %v1224_v57 = vpop.f32.mrf.mxu2 }
  0xff   : > { %v1247_v10 = vpop.f32.mrf.mxu3 }
 0x100   : > { %v1248_v7 = vadd.f32 %v1247_v10, %v1224_v57 }
 0x102   : > { %v1271_v37 = vadd.f32 %v1270_v52, %v1248_v7  ;;  %v958_v52 = vadd.f32 %v3883_v34, %v935_v36  ;;  %v3343_v34 = vld [vmem:[%s4469_s4 + $0x58] sm:$0xff] }
 0x103   : > { %v1272_v59 = vpop.f32.mrf.mxu0  ;;  %1560 = vmatpush.bf16.msra.mxu1 %v3343_v34 }
 0x104   : > { %v1284_v61 = vadd.f32 %v1271_v37, %v974_v4  ;;  %v981_v14 = vadd.f32 %v3885_v35, %v958_v52  ;;  %v3342_v35 = vld [vmem:[%s4469_s4 + $0x50] sm:$0xff] }
 0x106   : > { %v1293_v63 = vadd.f32 %v3923_v58, %v1284_v61  ;;  %v1226_v0 = vpop.f32.mrf.mxu2 }
 0x107   : > { %v1249_v17 = vpop.f32.mrf.mxu3  ;;  %1561 = vmatpush.bf16.msra.mxu1 %v3342_v35 }
 0x108   : > { %v1250_v1 = vadd.f32 %v1249_v17, %v1226_v0  ;;  %v1303_v2 = vmin.f32 %v1293_v63, 0.0  ;;  %vm1298_vm2 = vcmp.gt.f32.partialorder %v1293_v63, 0.0  ;;  %v1417_v17 = vld [vmem:[#allocation2] sm:$0xf] }
 0x10a   : > { %v1273_v8 = vadd.f32 %v1272_v59, %v1250_v1  ;;  %v1308_v9 = vmul.f32 1.442695, %v1303_v2  ;;  %v3349_v2 = vld [vmem:[%s4469_s4 + $0x88] sm:$0xff] }
 0x10b   : > { %v1275_v18 = vpop.f32.mrf.mxu0  ;;  %1739 = vmatpush.bf16.msrb.mxu3 %v3349_v2 }
 0x10c   : > { %v1285_v19 = vadd.f32 %v1273_v8, %v976_v5  ;;  %3452 = vpow2.f32 %v1308_v9  ;;  %v3341_v9 = vld [vmem:[%s4469_s4 + $0x48] sm:$0xff] }
 0x10d   : > { %1562 = vmatpush.bf16.msra.mxu1 %v3341_v9  ;;  %v3392_v9 = vld [vmem:[%s4471_s6 + $0x114] sm:$0xf0] }
 0x10e   : > { %v1294_v26 = vadd.f32 %v3923_v58, %v1285_v19  ;;  %v1229_v12 = vpop.f32.mrf.mxu2 }
 0x10f   : > { %v1252_v13 = vpop.f32.mrf.mxu3  ;;  %1740 = vmatpush.bf16.msrb.mxu3 %v3348_v22 }
 0x110   : > { %v1253_v33 = vadd.f32 %v1252_v13, %v1229_v12  ;;  %v1304_v43 = vmin.f32 %v1294_v26, 0.0  ;;  %vm1299_vm5 = vcmp.gt.f32.partialorder %v1294_v26, 0.0 }
 0x112   : > { %v3453_v45 = vpop.eup %3452  ;;  %v1276_v47 = vadd.f32 %v1275_v18, %v1253_v33  ;;  %v1310_v48 = vmul.f32 1.442695, %v1304_v43  ;;  %v4010_v33 = vpop.permute.xlu1 %1340 }
 0x113   : > { %v1277_v49 = vpop.f32.mrf.mxu0  ;;  %v2884_v50 = vadd.f32 -1.0, %v3453_v45 }
 0x114   : > { %v1286_v38 = vadd.f32 %v1276_v47, %v979_v46  ;;  %3454 = vpow2.f32 %v1310_v48  ;;  %v3200_v46 = vld [vmem:[%s4471_s6 + $0x110] sm:$0xf] }
 0x115   : > { %v1323_v54 = vsel %vm1298_vm2, %v1293_v63, %v2884_v50  ;;  %v961_v63 = vadd.f32 %v3891_v39, %v938_v27 }
 0x116   : > { %v3969_v55 = vadd.f32 %v3923_v58, %v1286_v38  ;;  %v1353_v56 = vmul.f32 %v3953_v44, %v1323_v54  ;;  %v1231_v57 = vpop.f32.mrf.mxu2 }
 0x117   : > { %v1254_v10 = vpop.f32.mrf.mxu3  ;;  %v984_v19 = vadd.f32 %v3893_v40, %v961_v63  ;;  %v3340_v40 = vld [vmem:[%s4469_s4 + $0x40] sm:$0xff] }
 0x118   : > { %v1358_v7 = vpack.c.bf16 %v1353_v56, %v1353_v56  ;;  %v1255_v21 = vadd.f32 %v1254_v10, %v1231_v57  ;;  %v1305_v41 = vmin.f32 %v3969_v55, 0.0  ;;  %vm1300_vm9 = vcmp.gt.f32.partialorder %v3969_v55, 0.0  ;;  %1563 = vmatpush.bf16.msra.mxu1 %v3340_v40 }
 0x11a   : > { %v3455_v4 = vpop.eup %3454  ;;  %v1367_v15 = vshrl.u32 %v1358_v7, 16  ;;  %v1278_v37 = vadd.f32 %v1277_v49, %v1255_v21  ;;  %v1312_v59 = vmul.f32 1.442695, %v1305_v41  ;;  %v1370_v32 = vshll.u32 %v1358_v7, 16 }
 0x11b   : > { %v2885_v61 = vadd.f32 -1.0, %v3455_v4  ;;  %v1280_v25 = vpop.f32.mrf.mxu0 }
 0x11c   : > { %v1369_v42 = vrot.slane %v1367_v15, 7  ;;  %v1287_v62 = vadd.f32 %v1278_v37, %v981_v14  ;;  %3456 = vpow2.f32 %v1312_v59  ;;  %v4030_v59 = vpop.permute.xlu2 %1350 }
 0x11d   : > { %v1324_v1 = vsel %vm1299_vm5, %v1294_v26, %v2885_v61 }
 0x11e   : > { %v1372_v3 = vor.u32 %v1370_v32, %v1369_v42  ;;  %v1354_v5 = vmul.f32 %v3981_v60, %v1324_v1  ;;  %v1296_v6 = vadd.f32 %v3923_v58, %v1287_v62  ;;  %v1234_v8 = vpop.f32.mrf.mxu2  ;;  %v1373_v47 = vrot.slane %v1369_v42, 4 }
 0x11f   : > { %v1257_v39 = vpop.f32.mrf.mxu3 }
 0x120   : > { %v1418_v11 = vsel %vm3989_vm6, %v1372_v3, %v1417_v17  ;;  %v1359_v16 = vpack.c.bf16 %v1354_v5, %v1354_v5  ;;  %v1258_v18 = vadd.f32 %v1257_v39, %v1234_v8  ;;  %v1306_v20 = vmin.f32 %v1296_v6, 0.0 }
 0x121   : > { %1419 = vst [vmem:[#allocation2] sm:$0xf] %v1418_v11  ;;  %vm1301_vm11 = vcmp.gt.f32.partialorder %v1296_v6, 0.0  ;;  %v1427_v11 = vld [vmem:[#allocation2 + $0x10] sm:$0x3] }
 0x122   : > { %v3457_v23 = vpop.eup %3456  ;;  %v1375_v24 = vshrl.u32 %v1359_v16, 16  ;;  %v1281_v26 = vadd.f32 %v1280_v25, %v1258_v18  ;;  %v1314_v13 = vmul.f32 1.442695, %v1306_v20  ;;  %v1378_v36 = vshll.u32 %v1359_v16, 16 }
 0x123   : > { %v2886_v12 = vadd.f32 -1.0, %v3457_v23  ;;  %v1282_v31 = vpop.f32.mrf.mxu0 }
 0x124   : > { %v1377_v43 = vrot.slane %v1375_v24, 7  ;;  %v1288_v28 = vadd.f32 %v1281_v26, %v984_v19  ;;  %3458 = vpow2.f32 %v1314_v13 }
 0x125   : > { %v1325_v45 = vsel %vm1300_vm9, %v3969_v55, %v2886_v12 }
 0x126   : > { %v1355_v48 = vmul.f32 %v4010_v33, %v1325_v45  ;;  %v1380_v49 = vor.u32 %v1378_v36, %v1377_v43  ;;  %v1297_v50 = vadd.f32 %v3923_v58, %v1288_v28  ;;  %v1236_v51 = vpop.f32.mrf.mxu2  ;;  %v1382_v21 = vrot.slane %v1377_v43, 4  ;;  %v4024_v58 = vpop.permute.xlu1 %1345 }
 0x127   : > { %v1259_v38 = vpop.f32.mrf.mxu3 }
 0x128   : > { %v1360_v52 = vpack.c.bf16 %v1355_v48, %v1355_v48  ;;  %v1381_v53 = vsel %vm4015_vm10, %v1373_v47, %v1380_v49  ;;  %v1307_v54 = vmin.f32 %v1297_v50, 0.0  ;;  %vm1302_vm12 = vcmp.gt.f32.partialorder %v1297_v50, 0.0  ;;  %v3414_v18 = vld [vmem:[#allocation2] sm:$0xe] }
 0x129   : > { %1421 = vst.msk [vmem:[#allocation2 + $0x4] sm:$0xf] %vm1414_vm3, %v1381_v53 }
 0x12a   : > { %v1384_v29 = vshrl.u32 %v1360_v52, 16  ;;  %v1316_v55 = vmul.f32 1.442695, %v1307_v54  ;;  %v3459_v56 = vpop.eup %3458  ;;  %v1387_v10 = vshll.u32 %v1360_v52, 16 }
 0x12b   : > { %v2887_v34 = vadd.f32 -1.0, %v3459_v56 }
 0x12c   : > { %v1386_v57 = vrot.slane %v1384_v29, 7  ;;  %3460 = vpow2.f32 %v1316_v55 }
 0x12d   : > { %v1326_v41 = vsel %vm1301_vm11, %v1296_v6, %v2887_v34 }
 0x12e   : > { %v1389_v7 = vor.u32 %v1387_v10, %v1386_v57  ;;  %v1356_v14 = vmul.f32 %v4024_v58, %v1326_v41  ;;  %v1391_v62 = vrot.slane %v1386_v57, 4  ;;  %v3371_v41 = vld [vmem:[%s4471_s6 + $0x74] sm:$0xf] }
 0x130   : > { %v1390_v27 = vsel %vm4015_vm10, %v1382_v21, %v1389_v7  ;;  %v3406_v30 = vld [vmem:[#allocation2] sm:$0xff]   ;;  %v1361_v4 = vpack.c.bf16 %v1356_v14, %v1356_v14  ;;  %v3168_v7 = vld [vmem:[%s4471_s6 + $0x70] sm:$0xf]  ;;  %v3372_v21 = vld [vmem:[%s4471_s6 + $0x74] sm:$0xf0] }
 0x131   : > { %1422 = vst.msk [vmem:[#allocation2 + $0x8] sm:$0xf] %vm1414_vm3, %v1390_v27  ;;  %1641 = vmatmul.bf16.vlgmr.msrb.gmra.mxu2 %v3406_v30  ;;  %v3413_v6 = vld [vmem:[#allocation2] sm:$0xf0]  ;;  %v1485_v8 = vshll.u32 %v3406_v30, 16  ;;  %v1483_v26 = vshrl.u32 %v3406_v30, 16  ;;  %v3169_v14 = vor.u32 %v3372_v21, %v3168_v7 }
 0x132   : > { %v3461_v15 = vpop.eup %3460  ;;  %v1393_v37 = vshrl.u32 %v1361_v4, 16  ;;  %v1396_v35 = vshll.u32 %v1361_v4, 16  ;;  %v3415_v19 = vor.u32 %v3414_v18, %v3413_v6  ;;  %v3170_v27 = vld [vmem:[%s4471_s6 + $0x78] sm:$0xf0]  ;;  %v3160_v4 = vld [vmem:[%s4471_s6 + $0x60] sm:$0xf] }
 0x133   : > { %v2888_v61 = vadd.f32 -1.0, %v3461_v15  ;;  %v1487_v22 = vrot.slane %v1485_v8, 1  ;;  %v3173_v30 = vor.u32 %v3371_v41, %v3170_v27  ;;  %2157 = vmatpush.bf16.msra.mxu2 %v3169_v14  ;;  %v3370_v15 = vld [vmem:[%s4471_s6 + $0x64] sm:$0xf0]  ;;  %v3365_v6 = vld [vmem:[%s4471_s6 + $0x44] sm:$0xf] }
 0x134   : > { %v1395_v25 = vrot.slane %v1393_v37, 7  ;;  %v1677_v12 = vrot.slane %v3415_v19, 1  ;;  %v3369_v37 = vld [vmem:[%s4471_s6 + $0x64] sm:$0xf]  ;;  %v3136_v19 = vld [vmem:[%s4471_s6 + $0x30] sm:$0xf] }
 0x135   : > { %v1327_v42 = vsel %vm1302_vm12, %v1297_v50, %v2888_v61  ;;  %v1488_v40 = vor.u32 %v1487_v22, %v1483_v26  ;;  %2180 = vmatpush.bf16.msra.mxu3 %v3173_v30  ;;  %v3161_v61 = vor.u32 %v3370_v15, %v3160_v4  ;;  %v3363_v22 = vld [vmem:[%s4471_s6 + $0x34] sm:$0xf]  ;;  %v3386_v7 = vld [vmem:[%s4471_s6 + $0xe4] sm:$0xf0]  ;;  %v3385_v21 = vld [vmem:[%s4471_s6 + $0xe4] sm:$0xf] }
 0x136   : > { %v1357_v32 = vmul.f32 %v4030_v59, %v1327_v42  ;;  %v1398_v63 = vor.u32 %v1396_v35, %v1395_v25  ;;  %v1400_v39 = vrot.slane %v1395_v25, 4  ;;  %v3162_v25 = vld [vmem:[%s4471_s6 + $0x68] sm:$0xf0]  ;;  %v3359_v15 = vld [vmem:[%s4471_s6 + $0x14] sm:$0xf] }
 0x137   : > { %v3165_v35 = vor.u32 %v3369_v37, %v3162_v25  ;;  %2158 = vmatpush.bf16.msra.mxu2 %v3161_v61  ;;  %v3098_v4 = vld [vmem:[%s4471_s6 + $0xe8] sm:$0xf0]  ;;  %v3122_v25 = vld [vmem:[%s4471_s6 + $0x18] sm:$0xf0] }
 0x138   : > { %v1362_v17 = vpack.c.bf16 %v1357_v32, %v1357_v32  ;;  %v1399_v1 = vsel %vm4015_vm10, %v1391_v62, %v1398_v63  ;;  %v3152_v32 = vld [vmem:[%s4471_s6 + $0x50] sm:$0xf]  ;;  %v3368_v62 = vld [vmem:[%s4471_s6 + $0x54] sm:$0xf0]  ;;  %v3367_v63 = vld [vmem:[%s4471_s6 + $0x54] sm:$0xf]  ;;  %v3101_v61 = vor.u32 %v3385_v21, %v3098_v4 }
 0x139   : > { %1423 = vst.msk [vmem:[#allocation2 + $0xc] sm:$0xf] %vm1414_vm3, %v1399_v1  ;;  %2181 = vmatpush.bf16.msra.mxu3 %v3165_v35  ;;  %v3154_v1 = vld [vmem:[%s4471_s6 + $0x58] sm:$0xf0] }
 0x13a   : > { %v1402_v2 = vshrl.u32 %v1362_v17, 16  ;;  %v1405_v5 = vshll.u32 %v1362_v17, 16  ;;  %v3153_v17 = vor.u32 %v3368_v62, %v3152_v32  ;;  %v3112_v32 = vld [vmem:[%s4471_s6] sm:$0xf]  ;;  %v3358_v62 = vld [vmem:[%s4471_s6 + $0x4] sm:$0xf0] }
 0x13c   : > { %v1404_v3 = vrot.slane %v1402_v2, 7  ;;  %v3157_v2 = vor.u32 %v3367_v63, %v3154_v1  ;;  %2159 = vmatpush.bf16.msra.mxu2 %v3153_v17  ;;  %v3357_v63 = vld [vmem:[%s4471_s6 + $0x4] sm:$0xf]  ;;  %v3113_v17 = vor.u32 %v3358_v62, %v3112_v32  ;;  %v3114_v1 = vld [vmem:[%s4471_s6 + $0x8] sm:$0xf0] }
 0x13e   : > { %v1407_v16 = vor.u32 %v1405_v5, %v1404_v3  ;;  %2182 = vmatpush.bf16.msra.mxu3 %v3157_v2  ;;  %v3144_v3 = vld [vmem:[%s4471_s6 + $0x40] sm:$0xf]  ;;  %v3366_v5 = vld [vmem:[%s4471_s6 + $0x44] sm:$0xf0] }
 0x13f   : > { %v3145_v8 = vor.u32 %v3366_v5, %v3144_v3  ;;  %v3088_v3 = vld [vmem:[%s4471_s6 + $0xd0] sm:$0xf]  ;;  %v3384_v5 = vld [vmem:[%s4471_s6 + $0xd4] sm:$0xf0] }
 0x140   : > { %v1408_v20 = vsel %vm4015_vm10, %v1400_v39, %v1407_v16  ;;  %v3331_v24 = vld [vmem:[#allocation2 + $0x8] sm:$0xff] }
 0x141   : > { %v1428_v23 = vsel %vm4036_vm15, %v1408_v20, %v1427_v11  ;;  %1646 = vmatmul.bf16.gmra.mxu2 %v3331_v24  ;;  %v1678_v13 = vrot.slane %v3331_v24, 1  ;;  %v1490_v31 = vshll.u32 %v3331_v24, 16  ;;  %v1494_v53 = vshrl.u32 %v3331_v24, 16  ;;  %v3146_v39 = vld [vmem:[%s4471_s6 + $0x48] sm:$0xf0] }
 0x142   : > { %1429 = vst [vmem:[#allocation2 + $0x10] sm:$0x3] %v1428_v23  ;;  %v3149_v11 = vor.u32 %v3365_v6, %v3146_v39  ;;  %2160 = vmatpush.bf16.msra.mxu2 %v3145_v8  ;;  %v3364_v20 = vld [vmem:[%s4471_s6 + $0x34] sm:$0xf0]  ;;  %v3138_v24 = vld [vmem:[%s4471_s6 + $0x38] sm:$0xf0]  ;;  %v3117_v8 = vor.u32 %v3357_v63, %v3114_v1 }
 0x143   : > { %v1679_v43 = vsel %vm1046_vm1, %v1677_v12, %v1678_v13  ;;  %v1492_v36 = vrot.slane %v1490_v31, 1  ;;  %v3137_v23 = vor.u32 %v3364_v20, %v3136_v19  ;;  %v4113_v12 = vld [vmem:[%s4470_s5] ss:$0 sm:$0xff]  ;;  %v3383_v6 = vld [vmem:[%s4471_s6 + $0xd4] sm:$0xf] }
 0x144   : > { %1741 = vmatmul.bf16.vlgmr.msrb.gmra.mxu3 %v1679_v43  ;;  %v3128_v43 = vld [vmem:[%s4471_s6 + $0x20] sm:$0xf] }
 0x145   : > { %v1493_v28 = vsel %vm465_vm0, %v1488_v40, %v1492_v36  ;;  %v1496_v55 = vor.u32 %v1494_v53, %v1492_v36  ;;  %2183 = vmatpush.bf16.msra.mxu3 %v3149_v11  ;;  %v3362_v36 = vld [vmem:[%s4471_s6 + $0x24] sm:$0xf0]  ;;  %v3089_v11 = vor.u32 %v3384_v5, %v3088_v3  ;;  %v3056_v3 = vld [vmem:[%s4471_s6 + $0x90] sm:$0xf]  ;;  %v3376_v5 = vld [vmem:[%s4471_s6 + $0x94] sm:$0xf0] }
 0x146   : > { %1564 = vmatmul.bf16.vlgmr.msra.gmra.mxu1 %v1493_v28  ;;  %2161 = vmatpush.bf16.msra.mxu2 %v3137_v23  ;;  %v3361_v28 = vld [vmem:[%s4471_s6 + $0x24] sm:$0xf] }
 0x149   : > { %v1451_v45 = vld [vmem:[#allocation2 + $0x10] sm:$0x3] }
 0x14a   : > { %v1434_v47 = vld [vmem:[#allocation2 + $0x10] sm:$0x1]  ;;  %v1478_v48 = vunpack.c.l.b16 %v1451_v45 }
 0x14b   : > { %v1580_v50 = vunpack.c.l.b16 %v1434_v47  ;;  %v3104_v45 = vld [vmem:[%s4471_s6 + $0xf0] sm:$0xf]  ;;  %v3388_v47 = vld [vmem:[%s4471_s6 + $0xf4] sm:$0xf0] }
 0x14c   : > { %v1481_v49 = vpack.c.b16 %v1478_v48, %v1478_v48  ;;  %v3387_v48 = vld [vmem:[%s4471_s6 + $0xf4] sm:$0xf] }
 0x14d   : > { %v1581_v38 = vpack.c.b16 %v1580_v50, %v1580_v50 }
 0x14e   : > { %v1498_v51 = vshll.u32 %v1481_v49, 16  ;;  %v1680_v52 = vrot.slane %v1481_v49, 1  ;;  %v1502_v57 = vshrl.u32 %v1481_v49, 16  ;;  %v3129_v49 = vor.u32 %v3362_v36, %v3128_v43 }
 0x150   : > { %v1500_v54 = vrot.slane %v1498_v51, 1  ;;  %v1681_v29 = vsel %vm1046_vm1, %v1678_v13, %v1680_v52  ;;  %v3141_v13 = vor.u32 %v3363_v22, %v3138_v24  ;;  %v3105_v51 = vor.u32 %v3388_v47, %v3104_v45  ;;  %2162 = vmatpush.bf16.msra.mxu2 %v3129_v49 }
 0x151   : > { %1651 = vmatmul.bf16.gmra.mxu2 %v1581_v38  ;;  %v3106_v38 = vld [vmem:[%s4471_s6 + $0xf8] sm:$0xf0] }
 0x152   : > { %v1501_v56 = vsel %vm465_vm0, %v1496_v55, %v1500_v54  ;;  %v1504_v10 = vor.u32 %v1502_v57, %v1500_v54  ;;  %2184 = vmatpush.bf16.msra.mxu3 %v3141_v13  ;;  %v3109_v54 = vor.u32 %v3387_v48, %v3106_v38  ;;  %2025 = vmatpush.bf16.msrb.mxu0 %v3105_v51  ;;  %v3120_v57 = vld [vmem:[%s4471_s6 + $0x10] sm:$0xf]  ;;  %v3080_v13 = vld [vmem:[%s4471_s6 + $0xc0] sm:$0xf] }
 0x153   : > { %v3072_v38 = vld [vmem:[%s4471_s6 + $0xb0] sm:$0xf] }
 0x154   : > { %1746 = vmatmul.bf16.gmra.mxu3 %v1681_v29  ;;  %2048 = vmatpush.bf16.msrb.mxu1 %v3109_v54 }
 0x156   : > { %1569 = vmatmul.bf16.gmra.mxu1 %v1501_v56 }
 0x158   : > { %2049 = vmatpush.bf16.msrb.mxu1 %v3101_v61 }
 0x164   : > { %1751 = vmatmul.bf16.gmra.mxu3 %v1680_v52  ;;  %v3130_v52 = vld [vmem:[%s4471_s6 + $0x28] sm:$0xf0] }
 0x165   : > { %v3133_v29 = vor.u32 %v3361_v28, %v3130_v52  ;;  %v3381_v28 = vld [vmem:[%s4471_s6 + $0xc4] sm:$0xf]  ;;  %v3380_v52 = vld [vmem:[%s4471_s6 + $0xb4] sm:$0xf0] }
 0x166   : > { %1574 = vmatmul.bf16.gmra.mxu1 %v1504_v10  ;;  %v3360_v10 = vld [vmem:[%s4471_s6 + $0x14] sm:$0xf0]  ;;  %v3073_v54 = vor.u32 %v3380_v52, %v3072_v38 }
 0x167   : > { %2185 = vmatpush.bf16.msra.mxu3 %v3133_v29  ;;  %v3121_v41 = vor.u32 %v3360_v10, %v3120_v57 }
 0x169   : > { %2163 = vmatpush.bf16.msra.mxu2 %v3121_v41 }
 0x16d   : > { %2164 = vmatpush.bf16.msra.mxu2 %v3113_v17 }
 0x1b4   : > { %v1642_v34 = vpop.f32.mrf.mxu2 }
 0x1bc   : > { %v1644_v42 = vpop.f32.mrf.mxu2 }
 0x1c3   : > { %v1565_v16 = vpop.f32.mrf.mxu1 }
 0x1c4   : > { %v4096_v18 = vpop.f32.mrf.mxu2  ;;  %v1643_v26 = vadd.f32 %v1642_v34, %v1565_v16  ;;  %v3096_v34 = vld [vmem:[%s4471_s6 + $0xe0] sm:$0xf]  ;;  %v3090_v16 = vld [vmem:[%s4471_s6 + $0xd8] sm:$0xf0] }
 0x1c5   : > { %v3097_v30 = vor.u32 %v3386_v7, %v3096_v34  ;;  %v3093_v22 = vor.u32 %v3383_v6, %v3090_v16 }
 0x1c7   : > { %v1742_v31 = vpop.f32.mrf.mxu3  ;;  %2026 = vmatpush.bf16.msrb.mxu0 %v3097_v30  ;;  %2050 = vmatpush.bf16.msrb.mxu1 %v3093_v22 }
 0x1c8   : > { %v1756_v40 = vadd.f32 %v1742_v31, %v1643_v26  ;;  %v3382_v31 = vld [vmem:[%s4471_s6 + $0xc4] sm:$0xf0] }
 0x1c9   : > { %v3081_v36 = vor.u32 %v3382_v31, %v3080_v13  ;;  %v3048_v13 = vld [vmem:[%s4471_s6 + $0x80] sm:$0xf] }
 0x1ca   : > { %v4134_v50 = vadd.f32 %v4113_v12, %v1756_v40 }
 0x1cb   : > { %v1567_v53 = vpop.f32.mrf.mxu1  ;;  %2027 = vmatpush.bf16.msrb.mxu0 %v3089_v11 }
 0x1cc   : > { %v1775_v55 = vmin.f32 %v4134_v50, 0.0  ;;  %v4143_v56 = vpop.f32.mrf.mxu2  ;;  %v1645_v27 = vadd.f32 %v1644_v42, %v1567_v53  ;;  %v3125_v42 = vor.u32 %v3359_v15, %v3122_v25  ;;  %vm1770_vm2 = vcmp.gt.f32.partialorder %v4134_v50, 0.0  ;;  %v3379_v53 = vld [vmem:[%s4471_s6 + $0xb4] sm:$0xf]  ;;  %v3378_v15 = vld [vmem:[%s4471_s6 + $0xa4] sm:$0xf0] }
 0x1ce   : > { %v1780_v14 = vmul.f32 1.442695, %v1775_v55  ;;  %2186 = vmatpush.bf16.msra.mxu3 %v3125_v42  ;;  %v1858_v42 = vld [vmem:[#allocation3] sm:$0xf] }
 0x1cf   : > { %v1744_v37 = vpop.f32.mrf.mxu3  ;;  %2028 = vmatpush.bf16.msrb.mxu0 %v3081_v36  ;;  %v3373_v36 = vld [vmem:[%s4471_s6 + $0x84] sm:$0xf] }
 0x1d0   : > { %3462 = vpow2.f32 %v1780_v14  ;;  %v1757_v35 = vadd.f32 %v1744_v37, %v1645_v27  ;;  %v3064_v14 = vld [vmem:[%s4471_s6 + $0xa0] sm:$0xf]  ;;  %v3377_v37 = vld [vmem:[%s4471_s6 + $0xa4] sm:$0xf] }
 0x1d2   : > { %v4182_v2 = vadd.f32 %v4113_v12, %v1757_v35  ;;  %2187 = vmatpush.bf16.msra.mxu3 %v3117_v8  ;;  %v3066_v35 = vld [vmem:[%s4471_s6 + $0xa8] sm:$0xf0]  ;;  %v3057_v8 = vor.u32 %v3376_v5, %v3056_v3 }
 0x1d3   : > { %v1570_v39 = vpop.f32.mrf.mxu1  ;;  %2029 = vmatpush.bf16.msrb.mxu0 %v3073_v54  ;;  %v3069_v62 = vor.u32 %v3377_v37, %v3066_v35  ;;  %v3248_v54 = vld [vmem:[%s4471_s6 + $0x170] sm:$0xf] }
 0x1d4   : > { %v1776_v19 = vmin.f32 %v4182_v2, 0.0  ;;  %v4197_v20 = vpop.f32.mrf.mxu2  ;;  %v1648_v26 = vadd.f32 %v4096_v18, %v1570_v39  ;;  %v3082_v18 = vld [vmem:[%s4471_s6 + $0xc8] sm:$0xf0]  ;;  %vm1771_vm4 = vcmp.gt.f32.partialorder %v4182_v2, 0.0 }
 0x1d5   : > { %v3085_v47 = vor.u32 %v3381_v28, %v3082_v18 }
 0x1d6   : > { %v3463_v23 = vpop.eup %3462  ;;  %v1782_v24 = vmul.f32 1.442695, %v1776_v19 }
 0x1d7   : > { %v3021_v40 = vadd.f32 -1.0, %v3463_v23  ;;  %v1747_v43 = vpop.f32.mrf.mxu3  ;;  %2051 = vmatpush.bf16.msrb.mxu1 %v3085_v47 }
 0x1d8   : > { %3464 = vpow2.f32 %v1782_v24  ;;  %v1758_v45 = vadd.f32 %v1747_v43, %v1648_v26  ;;  %v3374_v43 = vld [vmem:[%s4471_s6 + $0x84] sm:$0xf0] }
 0x1d9   : > { %v1795_v48 = vsel %vm1770_vm2, %v4134_v50, %v3021_v40  ;;  %v3049_v18 = vor.u32 %v3374_v43, %v3048_v13  ;;  %v3224_v13 = vld [vmem:[%s4471_s6 + $0x140] sm:$0xf] }
 0x1da   : > { %v1800_v49 = vmul.f32 %v1795_v48, %v3953_v44  ;;  %v4216_v51 = vadd.f32 %v4113_v12, %v1758_v45  ;;  %v3074_v44 = vld [vmem:[%s4471_s6 + $0xb8] sm:$0xf0]  ;;  %v3050_v45 = vld [vmem:[%s4471_s6 + $0x88] sm:$0xf0] }
 0x1db   : > { %v1572_v50 = vpop.f32.mrf.mxu1  ;;  %v3077_v10 = vor.u32 %v3379_v53, %v3074_v44  ;;  %v3053_v48 = vor.u32 %v3373_v36, %v3050_v45  ;;  %v3404_v44 = vld [vmem:[%s4471_s6 + $0x174] sm:$0xf0]  ;;  %v3395_v45 = vld [vmem:[%s4471_s6 + $0x134] sm:$0xf] }
 0x1dc   : > { %v1805_v29 = vpack.c.bf16 %v1800_v49, %v1800_v49  ;;  %v1777_v55 = vmin.f32 %v4216_v51, 0.0  ;;  %v1654_v57 = vpop.f32.mrf.mxu2  ;;  %v1650_v41 = vadd.f32 %v4143_v56, %v1572_v50  ;;  %v3065_v56 = vor.u32 %v3378_v15, %v3064_v14 }
 0x1dd   : > { %2052 = vmatpush.bf16.msrb.mxu1 %v3077_v10  ;;  %vm1772_vm5 = vcmp.gt.f32.partialorder %v4216_v51, 0.0  ;;  %v3240_v57 = vld [vmem:[%s4471_s6 + $0x160] sm:$0xf]  ;;  %v3249_v10 = vor.u32 %v3404_v44, %v3248_v54 }
 0x1de   : > { %v3465_v34 = vpop.eup %3464  ;;  %v1811_v7 = vshrl.u32 %v1805_v29, 16  ;;  %v1784_v21 = vmul.f32 1.442695, %v1777_v55  ;;  %v1814_v27 = vshll.u32 %v1805_v29, 16  ;;  %2030 = vmatpush.bf16.msrb.mxu0 %v3065_v56  ;;  %v3250_v55 = vld [vmem:[%s4471_s6 + $0x178] sm:$0xf0] }
 0x1df   : > { %v3022_v30 = vadd.f32 -1.0, %v3465_v34  ;;  %v1749_v4 = vpop.f32.mrf.mxu3 }
 0x1e0   : > { %v1813_v61 = vrot.slane %v1811_v7, 7  ;;  %3466 = vpow2.f32 %v1784_v21  ;;  %v1759_v25 = vadd.f32 %v1749_v4, %v1650_v41  ;;  %v3402_v7 = vld [vmem:[%s4471_s6 + $0x164] sm:$0xf0]  ;;  %v3401_v21 = vld [vmem:[%s4471_s6 + $0x164] sm:$0xf] }
 0x1e1   : > { %v1796_v32 = vsel %vm1771_vm4, %v4182_v2, %v3022_v30  ;;  %2053 = vmatpush.bf16.msrb.mxu1 %v3069_v62  ;;  %v3375_v2 = vld [vmem:[%s4471_s6 + $0x94] sm:$0xf]  ;;  %v3242_v30 = vld [vmem:[%s4471_s6 + $0x168] sm:$0xf0]  ;;  %v3241_v37 = vor.u32 %v3402_v7, %v3240_v57 }
 0x1e2   : > { %v1816_v63 = vor.u32 %v1814_v27, %v1813_v61  ;;  %v1801_v17 = vmul.f32 %v1796_v32, %v3981_v60  ;;  %v4250_v1 = vadd.f32 %v4113_v12, %v1759_v25  ;;  %v3058_v60 = vld [vmem:[%s4471_s6 + $0x98] sm:$0xf0]  ;;  %2031 = vmatpush.bf16.msrb.mxu0 %v3057_v8  ;;  %v1817_v49 = vrot.slane %v1813_v61, 4 }
 0x1e3   : > { %v1575_v6 = vpop.f32.mrf.mxu1  ;;  %v3061_v19 = vor.u32 %v3375_v2, %v3058_v60  ;;  %v3245_v61 = vor.u32 %v3401_v21, %v3242_v30  ;;  %v3399_v60 = vld [vmem:[%s4471_s6 + $0x154] sm:$0xf] }
 0x1e4   : > { %v1859_v39 = vsel %vm3989_vm6, %v1816_v63, %v1858_v42  ;;  %v1806_v11 = vpack.c.bf16 %v1801_v17, %v1801_v17  ;;  %v1778_v16 = vmin.f32 %v4250_v1, 0.0  ;;  %v1653_v26 = vadd.f32 %v4197_v20, %v1575_v6  ;;  %v3400_v6 = vld [vmem:[%s4471_s6 + $0x154] sm:$0xf0] }
 0x1e5   : > { %1860 = vst [vmem:[#allocation3] sm:$0xf] %v1859_v39  ;;  %2054 = vmatpush.bf16.msrb.mxu1 %v3061_v19  ;;  %vm1773_vm6 = vcmp.gt.f32.partialorder %v4250_v1, 0.0  ;;  %v3234_v39 = vld [vmem:[%s4471_s6 + $0x158] sm:$0xf0] }
 0x1e6   : > { %v3467_v22 = vpop.eup %3466  ;;  %v1819_v23 = vshrl.u32 %v1806_v11, 16  ;;  %v1786_v24 = vmul.f32 1.442695, %v1778_v16  ;;  %v1822_v31 = vshll.u32 %v1806_v11, 16  ;;  %2032 = vmatpush.bf16.msrb.mxu0 %v3049_v18  ;;  %v3237_v19 = vor.u32 %v3399_v60, %v3234_v39 }
 0x1e7   : > { %v3023_v0 = vadd.f32 -1.0, %v3467_v22  ;;  %v1752_v40 = vpop.f32.mrf.mxu3 }
 0x1e8   : > { %v1821_v28 = vrot.slane %v1819_v23, 7  ;;  %3468 = vpow2.f32 %v1786_v24  ;;  %v1760_v20 = vadd.f32 %v1752_v40, %v1653_v26 }
 0x1e9   : > { %v1797_v47 = vsel %vm1772_vm5, %v4216_v51, %v3023_v0  ;;  %2055 = vmatpush.bf16.msrb.mxu1 %v3053_v48  ;;  %v3403_v51 = vld [vmem:[%s4471_s6 + $0x174] sm:$0xf]  ;;  %v3397_v0 = vld [vmem:[%s4471_s6 + $0x144] sm:$0xf] }
 0x1ea   : > { %v1824_v38 = vor.u32 %v1822_v31, %v1821_v28  ;;  %v1802_v52 = vmul.f32 %v1797_v47, %v4010_v33  ;;  %v1769_v53 = vadd.f32 %v4113_v12, %v1760_v20  ;;  %v3253_v34 = vor.u32 %v3403_v51, %v3250_v55  ;;  %2312 = vmatpush.bf16.msra.mxu0 %v3249_v10  ;;  %v3398_v31 = vld [vmem:[%s4471_s6 + $0x144] sm:$0xf0]  ;;  %v3396_v20 = vld [vmem:[%s4471_s6 + $0x134] sm:$0xf0]  ;;  %v3218_v47 = vld [vmem:[%s4471_s6 + $0x138] sm:$0xf0] }
 0x1eb   : > { %v1577_v50 = vpop.f32.mrf.mxu1  ;;  %v1826_v42 = vrot.slane %v1821_v28, 4  ;;  %v3225_v36 = vor.u32 %v3398_v31, %v3224_v13  ;;  %v3216_v28 = vld [vmem:[%s4471_s6 + $0x130] sm:$0xf]  ;;  %v3393_v51 = vld [vmem:[%s4471_s6 + $0x124] sm:$0xf] }
 0x1ec   : > { %v1825_v33 = vsel %vm4015_vm10, %v1817_v49, %v1824_v38  ;;  %v1807_v29 = vpack.c.bf16 %v1802_v52, %v1802_v52  ;;  %v1779_v12 = vmin.f32 %v1769_v53, 0.0  ;;  %vm1774_vm7 = vcmp.gt.f32.partialorder %v1769_v53, 0.0  ;;  %v3394_v50 = vld [vmem:[%s4471_s6 + $0x124] sm:$0xf0]  ;;  %v1864_v55 = vld [vmem:[#allocation3 + $0x10] sm:$0x3] }
 0x1ed   : > { %1861 = vst.msk [vmem:[#allocation3 + $0x4] sm:$0xf] %vm1414_vm3, %v1825_v33  ;;  %2335 = vmatpush.bf16.msra.mxu1 %v3253_v34  ;;  %v3217_v49 = vor.u32 %v3396_v20, %v3216_v28  ;;  %v3221_v52 = vor.u32 %v3395_v45, %v3218_v47  ;;  %v3210_v33 = vld [vmem:[%s4471_s6 + $0x128] sm:$0xf0] }
 0x1ee   : > { %v3469_v41 = vpop.eup %3468  ;;  %v1828_v14 = vshrl.u32 %v1807_v29, 16  ;;  %v1788_v27 = vmul.f32 1.442695, %v1779_v12  ;;  %v1831_v56 = vshll.u32 %v1807_v29, 16  ;;  %2313 = vmatpush.bf16.msra.mxu0 %v3241_v37  ;;  %v3213_v10 = vor.u32 %v3393_v51, %v3210_v33  ;;  %v3391_v37 = vld [vmem:[%s4471_s6 + $0x114] sm:$0xf] }
 0x1ef   : > { %v3024_v4 = vadd.f32 -1.0, %v3469_v41  ;;  %v1754_v15 = vpop.f32.mrf.mxu3 }
 0x1f0   : > { %v1830_v25 = vrot.slane %v1828_v14, 7  ;;  %3470 = vpow2.f32 %v1788_v27 }
 0x1f1   : > { %v1798_v35 = vsel %vm1773_vm6, %v4250_v1, %v3024_v4  ;;  %2336 = vmatpush.bf16.msra.mxu1 %v3245_v61  ;;  %v3201_v61 = vor.u32 %v3392_v9, %v3200_v46 }
 0x1f2   : > { %v1833_v32 = vor.u32 %v1831_v56, %v1830_v25  ;;  %v1803_v62 = vmul.f32 %v1798_v35, %v4024_v58  ;;  %v3232_v58 = vld [vmem:[%s4471_s6 + $0x150] sm:$0xf]  ;;  %v1835_v23 = vrot.slane %v1830_v25, 4  ;;  %v3202_v25 = vld [vmem:[%s4471_s6 + $0x118] sm:$0xf0] }
 0x1f3   : > { %v3233_v2 = vor.u32 %v3400_v6, %v3232_v58  ;;  %v3192_v56 = vld [vmem:[%s4471_s6 + $0x100] sm:$0xf]  ;;  %v3390_v35 = vld [vmem:[%s4471_s6 + $0x104] sm:$0xf0] }
 0x1f4   : > { %v1834_v63 = vsel %vm4015_vm10, %v1826_v42, %v1833_v32  ;;  %v1808_v17 = vpack.c.bf16 %v1803_v62, %v1803_v62  ;;  %v4318_v3 = vld [vmem:[#allocation3] sm:$0xff]   ;;  %v3205_v62 = vor.u32 %v3391_v37, %v3202_v25 }
 0x1f5   : > { %1862 = vst.msk [vmem:[#allocation3 + $0x8] sm:$0xf] %vm1414_vm3, %v1834_v63  ;;  %2165 = vmatmul.bf16.vlgmr.msra.gmra.mxu2 %v4318_v3  ;;  %2188 = vmatmul.bf16.vlgmr.msra.gmra.mxu3 %v4318_v3  ;;  %v1922_v38 = vshll.u32 %v4318_v3, 16  ;;  %v1920_v14 = vshrl.u32 %v4318_v3, 16  ;;  %v3389_v63 = vld [vmem:[%s4471_s6 + $0x104] sm:$0xf]  ;;  %v3193_v3 = vor.u32 %v3390_v35, %v3192_v56 }
 0x1f6   : > { %v3471_v5 = vpop.eup %3470  ;;  %v1837_v1 = vshrl.u32 %v1808_v17, 16  ;;  %v1840_v16 = vshll.u32 %v1808_v17, 16  ;;  %2314 = vmatpush.bf16.msra.mxu0 %v3233_v2  ;;  %2337 = vmatpush.bf16.msra.mxu1 %v3237_v19 }
 0x1f7   : > { %v3025_v8 = vadd.f32 -1.0, %v3471_v5  ;;  %v1924_v7 = vrot.slane %v1922_v38, 1  ;;  %v3194_v5 = vld [vmem:[%s4471_s6 + $0x108] sm:$0xf0] }
 0x1f8   : > { %v1839_v11 = vrot.slane %v1837_v1, 7  ;;  %v3197_v1 = vor.u32 %v3389_v63, %v3194_v5 }
 0x1f9   : > { %v1799_v22 = vsel %vm1774_vm7, %v1769_v53, %v3025_v8  ;;  %v3208_v53 = vld [vmem:[%s4471_s6 + $0x120] sm:$0xf]  ;;  %v1925_v30 = vor.u32 %v1924_v7, %v1920_v14 }
 0x1fa   : > { %v1842_v24 = vor.u32 %v1840_v16, %v1839_v11  ;;  %v1804_v26 = vmul.f32 %v1799_v22, %v4030_v59  ;;  %v3226_v59 = vld [vmem:[%s4471_s6 + $0x148] sm:$0xf0]  ;;  %2315 = vmatpush.bf16.msra.mxu0 %v3225_v36  ;;  %v1844_v29 = vrot.slane %v1839_v11, 4  ;;  %v3209_v57 = vor.u32 %v3394_v50, %v3208_v53 }
 0x1fb   : > { %v3229_v18 = vor.u32 %v3397_v0, %v3226_v59 }
 0x1fc   : > { %v1843_v40 = vsel %vm4015_vm10, %v1835_v23, %v1842_v24  ;;  %v1809_v43 = vpack.c.bf16 %v1804_v26, %v1804_v26  ;;  %v3416_v23 = vld [vmem:[#allocation3] sm:$0xf0]  ;;  %v3417_v24 = vld [vmem:[#allocation3] sm:$0xe] }
 0x1fd   : > { %1863 = vst.msk [vmem:[#allocation3 + $0xc] sm:$0xf] %vm1414_vm3, %v1843_v40  ;;  %2338 = vmatpush.bf16.msra.mxu1 %v3229_v18  ;;  %v3418_v26 = vor.u32 %v3417_v24, %v3416_v23 }
 0x1fe   : > { %v1846_v48 = vshrl.u32 %v1809_v43, 16  ;;  %v1849_v44 = vshll.u32 %v1809_v43, 16  ;;  %2316 = vmatpush.bf16.msra.mxu0 %v3217_v49 }
 0x1ff   : > { %v2224_v31 = vrot.slane %v3418_v26, 1 }
 0x200   : > { %v1848_v54 = vrot.slane %v1846_v48, 7 }
 0x201   : > { %2339 = vmatpush.bf16.msra.mxu1 %v3221_v52 }
 0x202   : > { %v1851_v12 = vor.u32 %v1849_v44, %v1848_v54  ;;  %2317 = vmatpush.bf16.msra.mxu0 %v3209_v57  ;;  %v3481_v57 = vmov 0.0  }
 0x203   : > { %2424 = vst [vmem:[%s4421_s18 + $0x40] sm:$0xc] %v3481_v57 }
 0x204   : > { %v1852_v34 = vsel %vm4015_vm10, %v1844_v29, %v1851_v12  ;;  %v3356_v21 = vld [vmem:[#allocation3 + $0x8] sm:$0xff]  ;;  %2425 = vst [vmem:[%s4421_s18 + $0x48] sm:$0xc] %v3481_v57 }
 0x205   : > { %v1865_v41 = vsel %vm4036_vm15, %v1852_v34, %v1864_v55  ;;  %2170 = vmatmul.bf16.gmra.mxu2 %v3356_v21  ;;  %2193 = vmatmul.bf16.gmra.mxu3 %v3356_v21  ;;  %v1927_v27 = vshll.u32 %v3356_v21, 16  ;;  %v1931_v60 = vshrl.u32 %v3356_v21, 16  ;;  %v2225_v13 = vrot.slane %v3356_v21, 1 }
 0x206   : > { %1866 = vst [vmem:[#allocation3 + $0x10] sm:$0x3] %v1865_v41  ;;  %2340 = vmatpush.bf16.msra.mxu1 %v3213_v10  ;;  %2318 = vmatpush.bf16.msra.mxu0 %v3201_v61  ;;  %v2368_v41 = vld [vmem:[%s4472_s7] sm:$0x3] }
 0x207   : > { %v1929_v4 = vrot.slane %v1927_v27, 1  ;;  %v2226_v0 = vsel %vm1046_vm1, %v2224_v31, %v2225_v13 }
 0x209   : > { %v1930_v15 = vsel %vm465_vm0, %v1925_v30, %v1929_v4  ;;  %v1933_v11 = vor.u32 %v1931_v60, %v1929_v4  ;;  %v4432_v30 = vperm.slane %v2368_v41, 0  ;;  %v4434_v4 = vperm.slane %v2368_v41, 1 }
 0x20a   : > { %2033 = vmatmul.bf16.vlgmr.msrb.gmra.mxu0 %v1930_v15  ;;  %2056 = vmatmul.bf16.vlgmr.msrb.gmra.mxu1 %v1930_v15 }
 0x20b   : > { %2341 = vmatpush.bf16.msra.mxu1 %v3205_v62  ;;  %2319 = vmatpush.bf16.msra.mxu0 %v3193_v3 }
 0x20d   : > { %v1871_v42 = vld [vmem:[#allocation3 + $0x10] sm:$0x1] }
 0x20e   : > { %v1888_v32 = vld [vmem:[#allocation3 + $0x10] sm:$0x3]  ;;  %v2072_v58 = vunpack.c.l.b16 %v1871_v42 }
 0x20f   : > { %v1915_v17 = vunpack.c.l.b16 %v1888_v32  ;;  %2342 = vmatpush.bf16.msra.mxu1 %v3197_v1 }
 0x210   : > { %v2073_v2 = vpack.c.b16 %v2072_v58, %v2072_v58 }
 0x211   : > { %v1918_v6 = vpack.c.b16 %v1915_v17, %v1915_v17 }
 0x213   : > { %v1935_v8 = vshll.u32 %v1918_v6, 16  ;;  %v1939_v19 = vshrl.u32 %v1918_v6, 16  ;;  %v2227_v40 = vrot.slane %v1918_v6, 1 }
 0x215   : > { %2175 = vmatmul.bf16.gmra.mxu2 %v2073_v2  ;;  %2198 = vmatmul.bf16.gmra.mxu3 %v2073_v2  ;;  %v1937_v39 = vrot.slane %v1935_v8, 1  ;;  %v2228_v43 = vsel %vm1046_vm1, %v2225_v13, %v2227_v40 }
 0x217   : > { %v1938_v16 = vsel %vm465_vm0, %v1933_v11, %v1937_v39  ;;  %v1941_v22 = vor.u32 %v1939_v19, %v1937_v39 }
 0x21a   : > { %2038 = vmatmul.bf16.gmra.mxu0 %v1938_v16  ;;  %2061 = vmatmul.bf16.gmra.mxu1 %v1938_v16 }
 0x22a   : > { %2043 = vmatmul.bf16.gmra.mxu0 %v1941_v22  ;;  %2066 = vmatmul.bf16.gmra.mxu1 %v1941_v22 }
 0x23a   : > { %2320 = vmatmul.bf16.vlgmr.msra.gmra.mxu0 %v2226_v0  ;;  %2343 = vmatmul.bf16.vlgmr.msra.gmra.mxu1 %v2226_v0 }
 0x24a   : > { %2325 = vmatmul.bf16.gmra.mxu0 %v2228_v43  ;;  %2348 = vmatmul.bf16.gmra.mxu1 %v2228_v43 }
 0x25a   : > { %2330 = vmatmul.bf16.gmra.mxu0 %v2227_v40  ;;  %2353 = vmatmul.bf16.gmra.mxu1 %v2227_v40 }
 0x278   : > { %v2166_v36 = vpop.f32.mrf.mxu2  ;;  %v2189_v59 = vpop.f32.mrf.mxu3 }
 0x280   : > { %v2168_v28 = vpop.f32.mrf.mxu2  ;;  %v2191_v20 = vpop.f32.mrf.mxu3 }
 0x287   : > { %v2034_v18 = vpop.f32.mrf.mxu0  ;;  %v2057_v45 = vpop.f32.mrf.mxu1 }
 0x288   : > { %v2171_v47 = vpop.f32.mrf.mxu2  ;;  %v2194_v48 = vpop.f32.mrf.mxu3  ;;  %v2167_v14 = vadd.f32 %v2166_v36, %v2034_v18  ;;  %v2190_v27 = vadd.f32 %v2189_v59, %v2057_v45 }
 0x28f   : > { %v2036_v49 = vpop.f32.mrf.mxu0  ;;  %v2059_v38 = vpop.f32.mrf.mxu1 }
 0x290   : > { %v4409_v52 = vpop.f32.mrf.mxu2  ;;  %v4411_v53 = vpop.f32.mrf.mxu3  ;;  %v2169_v42 = vadd.f32 %v2168_v28, %v2036_v49  ;;  %v2192_v32 = vadd.f32 %v2191_v20, %v2059_v38 }
 0x297   : > { %v2039_v50 = vpop.f32.mrf.mxu0  ;;  %v2062_v54 = vpop.f32.mrf.mxu1 }
 0x298   : > { %v4413_v44 = vpop.f32.mrf.mxu2  ;;  %v4415_v51 = vpop.f32.mrf.mxu3  ;;  %v2172_v60 = vadd.f32 %v2171_v47, %v2039_v50  ;;  %v2195_v39 = vadd.f32 %v2194_v48, %v2062_v54 }
 0x29f   : > { %v2041_v33 = vpop.f32.mrf.mxu0  ;;  %v2064_v29 = vpop.f32.mrf.mxu1 }
 0x2a0   : > { %v2178_v12 = vpop.f32.mrf.mxu2  ;;  %v2201_v55 = vpop.f32.mrf.mxu3  ;;  %v2174_v40 = vadd.f32 %v4409_v52, %v2041_v33  ;;  %v2197_v43 = vadd.f32 %v4411_v53, %v2064_v29 }
 0x2a7   : > { %v4425_v10 = vpop.f32.mrf.mxu0  ;;  %v4427_v34 = vpop.f32.mrf.mxu1 }
 0x2a8   : > { %v2177_v52 = vadd.f32 %v4413_v44, %v4425_v10  ;;  %v2200_v53 = vadd.f32 %v4415_v51, %v4427_v34 }
 0x2af   : > { %v2046_v7 = vpop.f32.mrf.mxu0  ;;  %v2069_v21 = vpop.f32.mrf.mxu1 }
 0x2b7   : > { %v2321_v15 = vpop.f32.mrf.mxu0  ;;  %v2344_v46 = vpop.f32.mrf.mxu1 }
 0x2b8   : > { %v2358_v9 = vadd.f32 %v2321_v15, %v2167_v14  ;;  %v2359_v37 = vadd.f32 %v2344_v46, %v2190_v27 }
 0x2ba   : > { %v2374_v61 = vadd.f32 %v4432_v30, %v2358_v9  ;;  %v2375_v25 = vadd.f32 %v4434_v4, %v2359_v37 }
 0x2bc   : > { %vm2384_vm0 = vcmp.gt.f32.partialorder %v2374_v61, 0.0  ;;  %v2394_v56 = vmul.f32 0.01, %v2374_v61  ;;  %vm2385_vm1 = vcmp.gt.f32.partialorder %v2375_v25, 0.0  ;;  %v2395_v35 = vmul.f32 0.01, %v2375_v25 }
 0x2be   : > { %v2404_v62 = vsel %vm2384_vm0, %v2374_v61, %v2394_v56  ;;  %v2405_v63 = vsel %vm2385_vm1, %v2375_v25, %v2395_v35 }
 0x2bf   : > { %2414 = vst [vmem:[%s4421_s18] sm:$0xff] %v2404_v62  ;;  %v2323_v17 = vpop.f32.mrf.mxu0  ;;  %v2346_v3 = vpop.f32.mrf.mxu1 }
 0x2c0   : > { %2415 = vst [vmem:[%s4421_s18 + $0x8] sm:$0xff] %v2405_v63  ;;  %v2360_v5 = vadd.f32 %v2323_v17, %v2169_v42  ;;  %v2361_v1 = vadd.f32 %v2346_v3, %v2192_v32 }
 0x2c2   : > { %v2376_v58 = vadd.f32 %v4432_v30, %v2360_v5  ;;  %v2377_v6 = vadd.f32 %v4434_v4, %v2361_v1 }
 0x2c4   : > { %vm2386_vm3 = vcmp.gt.f32.partialorder %v2376_v58, 0.0  ;;  %v2396_v8 = vmul.f32 0.01, %v2376_v58  ;;  %vm2387_vm8 = vcmp.gt.f32.partialorder %v2377_v6, 0.0  ;;  %v2397_v2 = vmul.f32 0.01, %v2377_v6 }
 0x2c6   : > { %v2406_v11 = vsel %vm2386_vm3, %v2376_v58, %v2396_v8  ;;  %v2407_v16 = vsel %vm2387_vm8, %v2377_v6, %v2397_v2 }
 0x2c7   : > { %2416 = vst [vmem:[%s4421_s18 + $0x10] sm:$0xff] %v2406_v11  ;;  %v2326_v19 = vpop.f32.mrf.mxu0  ;;  %v2349_v22 = vpop.f32.mrf.mxu1 }
 0x2c8   : > { %2417 = vst [vmem:[%s4421_s18 + $0x18] sm:$0xff] %v2407_v16  ;;  %v2362_v23 = vadd.f32 %v2326_v19, %v2172_v60  ;;  %v2363_v24 = vadd.f32 %v2349_v22, %v2195_v39 }
 0x2ca   : > { %v2378_v26 = vadd.f32 %v4432_v30, %v2362_v23  ;;  %v2379_v13 = vadd.f32 %v4434_v4, %v2363_v24 }
 0x2cc   : > { %vm2388_vm9 = vcmp.gt.f32.partialorder %v2378_v26, 0.0  ;;  %v2398_v31 = vmul.f32 0.01, %v2378_v26  ;;  %vm2389_vm10 = vcmp.gt.f32.partialorder %v2379_v13, 0.0  ;;  %v2399_v0 = vmul.f32 0.01, %v2379_v13 }
 0x2ce   : > { %v2408_v36 = vsel %vm2388_vm9, %v2378_v26, %v2398_v31  ;;  %v2409_v59 = vsel %vm2389_vm10, %v2379_v13, %v2399_v0 }
 0x2cf   : > { %2418 = vst [vmem:[%s4421_s18 + $0x20] sm:$0xff] %v2408_v36  ;;  %v2328_v28 = vpop.f32.mrf.mxu0  ;;  %v2351_v20 = vpop.f32.mrf.mxu1 }
 0x2d0   : > { %2419 = vst [vmem:[%s4421_s18 + $0x28] sm:$0xff] %v2409_v59  ;;  %v2364_v18 = vadd.f32 %v2328_v28, %v2174_v40  ;;  %v2365_v45 = vadd.f32 %v2351_v20, %v2197_v43 }
 0x2d2   : > { %v2380_v47 = vadd.f32 %v4432_v30, %v2364_v18  ;;  %v2381_v48 = vadd.f32 %v4434_v4, %v2365_v45 }
 0x2d4   : > { %vm2390_vm11 = vcmp.gt.f32.partialorder %v2380_v47, 0.0  ;;  %v2400_v49 = vmul.f32 0.01, %v2380_v47  ;;  %vm2391_vm12 = vcmp.gt.f32.partialorder %v2381_v48, 0.0  ;;  %v2401_v38 = vmul.f32 0.01, %v2381_v48 }
 0x2d6   : > { %v2410_v50 = vsel %vm2390_vm11, %v2380_v47, %v2400_v49  ;;  %v2411_v54 = vsel %vm2391_vm12, %v2381_v48, %v2401_v38 }
 0x2d7   : > { %2420 = vst [vmem:[%s4421_s18 + $0x30] sm:$0xff] %v2410_v50  ;;  %v2331_v33 = vpop.f32.mrf.mxu0  ;;  %v2354_v29 = vpop.f32.mrf.mxu1 }
 0x2d8   : > { %2421 = vst [vmem:[%s4421_s18 + $0x38] sm:$0xff] %v2411_v54  ;;  %v2366_v12 = vadd.f32 %v2331_v33, %v2177_v52  ;;  %v2367_v55 = vadd.f32 %v2354_v29, %v2200_v53 }
 0x2da   : > { %v2382_v57 = vadd.f32 %v4432_v30, %v2366_v12  ;;  %v2383_v7 = vadd.f32 %v4434_v4, %v2367_v55 }
 0x2dc   : > { %vm2392_vm13 = vcmp.gt.f32.partialorder %v2382_v57, 0.0  ;;  %v2402_v21 = vmul.f32 0.01, %v2382_v57  ;;  %vm2393_vm14 = vcmp.gt.f32.partialorder %v2383_v7, 0.0  ;;  %v2403_v44 = vmul.f32 0.01, %v2383_v7 }
 0x2de   : > { %v2412_v10 = vsel %vm2392_vm13, %v2382_v57, %v2402_v21  ;;  %v2413_v51 = vsel %vm2393_vm14, %v2383_v7, %v2403_v44 }
 0x2df   : > { %2422 = vst [vmem:[%s4421_s18 + $0x40] sm:$0x3] %v2412_v10  ;;  %v2333_v34 = vpop.f32.mrf.mxu0  ;;  %v2356_v41 = vpop.f32.mrf.mxu1 }
 0x2e0   : > { %2423 = vst [vmem:[%s4421_s18 + $0x48] sm:$0x3] %v2413_v51 }
 0x2e1 PF: > { %s18_s27 = sadd.s32 1, %s3478_s27  }
 0x2e2   : > { %p15_p4 = scmp.ge.s32.totalorder %s18_s27, 4  }
 0x2e4   :  { %17 = sbr.rel (!%p15_p4) target bundleno = 1 (0x1), region = 88 }

</bundles_post_ra>
